<compile_context>
chip_gen: v7x
topology: tpu7x:2x2x1
jax: 0.10.0
libtpu: 0.0.40
codegen_flags: <defaults>
</compile_context>

<pallas_src>
import jax
import jax.numpy as jnp
from jax import lax
from jax.experimental import pallas as pl
from jax.experimental.pallas import tpu as pltpu


def _round_up(x, m):
    return ((x + m - 1) // m) * m


def _embedding_gather_kernel(idx_ref, tbl_ref, out_ref, acc_ref):
    """One (row-tile, vocab-chunk) grid step of the packed one-hot MXU gather.

    idx_ref: (tile_phys, pack) int32  -- expanded ids: slot p holds p*num_pad + id
    tbl_ref: (chunk_rows, lanes) f32  -- one row-chunk of the expanded (block-diag) table
    out_ref: (tile_phys, lanes)       -- lane-dense packed output tile
    acc_ref: (tile_phys, lanes) f32   -- VMEM accumulator scratch
    """
    c = pl.program_id(1)

    @pl.when(c == 0)
    def _():
        acc_ref[...] = jnp.zeros_like(acc_ref)

    tile_phys = out_ref.shape[0]
    chunk_rows = tbl_ref.shape[0]
    base = c * chunk_rows

    # Global expanded-table row id per one-hot column.
    g = lax.broadcasted_iota(jnp.int32, (tile_phys, chunk_rows), 1) + base
    flat = idx_ref[...]                                   # (tile_phys, pack)
    pack = flat.shape[1]
    hit = g == flat[:, 0:1]
    for p in range(1, pack):                              # static, tiny (pack <= 128/D)
        hit = jnp.logical_or(hit, g == flat[:, p : p + 1])
    onehot = hit.astype(jnp.float32)

    # HIGHEST precision: one-hot 1.0 is exact in bf16 and the f32 hi/lo split of each
    # table value sums back exactly, so the gather is bit-exact.
    acc_ref[...] += jnp.dot(
        onehot,
        tbl_ref[...],
        precision=lax.Precision.HIGHEST,
        preferred_element_type=jnp.float32,
    )

    @pl.when(c == pl.num_programs(1) - 1)
    def _():
        out_ref[...] = acc_ref[...].astype(out_ref.dtype)


def embedding_forward(table, idx, *, tile_phys_rows=512, vocab_chunk_rows=2048):
    """Pallas equivalent of torch.nn.Embedding(num, D)(idx).

    tile_phys_rows: physical 128-lane output rows per grid step (multiple of 8).
                    512 physical rows = 2048 logical embeddings at D=32.
                    (On v5e a smaller value, e.g. 256, keeps the single vst slot the
                    non-binding unit for large vocabularies.)
    vocab_chunk_rows: expanded-table rows processed per inner grid step.
    """
    assert tile_phys_rows % 8 == 0
    num, dim = table.shape
    orig_shape = idx.shape

    flat_idx = idx.reshape(-1).astype(jnp.int32)
    n = flat_idx.shape[0]

    # ---- lane packing ------------------------------------------------------
    if dim <= 128 and 128 % dim == 0:
        pack = 128 // dim          # logical embeddings per physical 128-lane row
        lanes = 128
    else:
        pack = 1
        lanes = _round_up(dim, 128)

    num_pad = _round_up(num, 128)  # per-slot vocab size inside the expanded table

    # ---- expanded (block-diagonal) table, built once in the wrapper --------
    table_pad = table
    if num_pad != num:
        table_pad = jnp.pad(table, ((0, num_pad - num), (0, 0)))
    if pack > 1:
        # T_exp[p*num_pad + k, p*dim + d] = table[k, d]  (zeros off the block diagonal)
        eye = jnp.eye(pack, dtype=table.dtype)
        tbl_exp = jnp.einsum("kd,pq->pkqd", table_pad, eye).reshape(
            pack * num_pad, pack * dim
        )
    else:
        tbl_exp = table_pad
        if lanes != dim:
            tbl_exp = jnp.pad(tbl_exp, ((0, 0), (0, lanes - dim)))
    exp_rows = tbl_exp.shape[0]

    chunk_rows = _round_up(min(vocab_chunk_rows, _round_up(exp_rows, 8)), 8)
    exp_rows_pad = _round_up(exp_rows, chunk_rows)
    if exp_rows_pad != exp_rows:
        tbl_exp = jnp.pad(tbl_exp, ((0, exp_rows_pad - exp_rows), (0, 0)))
    num_chunks = exp_rows_pad // chunk_rows

    # ---- tile / pad the indices --------------------------------------------
    n_phys = pl.cdiv(n, pack)
    if n_phys <= tile_phys_rows:
        tile_phys = max(8, _round_up(n_phys, 8))
        num_tiles = 1
    else:
        tile_phys = tile_phys_rows
        num_tiles = pl.cdiv(n_phys, tile_phys)
        if num_tiles > 1 and num_tiles % 2 == 1:
            num_tiles += 1          # balance the 2 v7x TensorCores (free elsewhere)
    n_phys_pad = num_tiles * tile_phys
    n_log_pad = n_phys_pad * pack
    if n_log_pad != n:
        flat_idx = jnp.pad(flat_idx, (0, n_log_pad - n))   # padded ids -> row 0, sliced off
    # Expanded ids: logical slot p of a physical row looks up row p*num_pad + id.
    idx2d = (
        flat_idx.reshape(n_phys_pad, pack)
        + jnp.arange(pack, dtype=jnp.int32)[None, :] * num_pad
    )

    # ---- VMEM budget (generation-aware) -------------------------------------
    itemsize = 4
    vmem_needed = (
        2 * tile_phys * pack * itemsize       # idx blocks (double buffered)
        + 2 * chunk_rows * lanes * itemsize   # table blocks
        + 2 * tile_phys * lanes * itemsize    # output blocks
        + tile_phys * lanes * itemsize        # accumulator scratch
        + tile_phys * chunk_rows * itemsize   # one-hot intermediate
        + (2 << 20)                           # slack
    )
    try:
        device_vmem = pltpu.get_tpu_info().vmem_capacity_bytes
    except Exception:  # pragma: no cover - conservative fallback
        device_vmem = 64 << 20                # v7x per-TC VMEM (smallest generation)
    vmem_limit = None
    if vmem_needed > (32 << 20):
        vmem_limit = int(min(vmem_needed, int(device_vmem * 0.85)))

    cost = pl.CostEstimate(
        flops=2 * n_phys_pad * exp_rows_pad * lanes,
        transcendentals=0,
        bytes_accessed=(
            n_phys_pad * pack * itemsize
            + num_tiles * exp_rows_pad * lanes * itemsize
            + n_phys_pad * lanes * itemsize
        ),
    )

    out_flat = pl.pallas_call(
        _embedding_gather_kernel,
        out_shape=jax.ShapeDtypeStruct((n_phys_pad, lanes), table.dtype),
        grid=(num_tiles, num_chunks),
        in_specs=[
            pl.BlockSpec((tile_phys, pack), lambda i, c: (i, 0)),
            pl.BlockSpec((chunk_rows, lanes), lambda i, c: (c, 0)),
        ],
        # Same output block across the vocab-chunk axis -> accumulator pattern (P3).
        # (If xprof shows exposed output writeback, add pipeline_mode=pl.Buffered(3).)
        out_specs=pl.BlockSpec((tile_phys, lanes), lambda i, c: (i, 0)),
        scratch_shapes=[pltpu.VMEM((tile_phys, lanes), jnp.float32)],
        compiler_params=pltpu.CompilerParams(
            dimension_semantics=("parallel", "arbitrary"),
            vmem_limit_bytes=vmem_limit,
        ),
        cost_estimate=cost,
    )(idx2d, tbl_exp)

    # Unpack: contiguous reshape (free) + leading-axis slice, no strided slab copy.
    if pack > 1:
        out = out_flat.reshape(n_phys_pad * pack, dim)[:n]
    else:
        out = out_flat[:n, :dim]
    return out.reshape(orig_shape + (dim,))


if __name__ == "__main__":
    # Small, module-consistent shapes: num_embeddings=32, embedding_dim=32,
    # idx of shape (batch=2, seq=8).
    num_embeddings = 32
    embedding_dim = 32

    key = jax.random.PRNGKey(0)
    k_table, k_idx = jax.random.split(key)

    # torch.nn.Embedding default init: weight ~ N(0, 1)
    table = jax.random.normal(
        k_table, (num_embeddings, embedding_dim), dtype=jnp.float32
    )
    idx = jax.random.randint(k_idx, (2, 8), 0, num_embeddings, dtype=jnp.int32)

    out = embedding_forward(table, idx)
    out = jax.block_until_ready(out)

    # Reference check: plain JAX gather (should match bit-exactly).
    ref = table[idx]
    assert out.shape == (2, 8, embedding_dim), out.shape
    assert jnp.allclose(out, ref, rtol=0.0, atol=1e-6), (
        "Pallas embedding mismatch vs reference gather"
    )

    print("KERNEL_OK")
</pallas_src>

<mosaic_0001>
module attributes {stable_mosaic.version = 11 : i64} {
  func.func @_embedding_gather_kernel(%arg0: i32, %arg1: i32, %arg2: memref<8x4xi32, #tpu.memory_space<vmem>>, %arg3: memref<512x128xf32, #tpu.memory_space<vmem>>, %arg4: memref<8x128xf32, #tpu.memory_space<vmem>>, %arg5: memref<8x128xf32, #tpu.memory_space<vmem>>) attributes {dimension_semantics = [#tpu.dimension_semantics<parallel>, #tpu.dimension_semantics<arbitrary>], iteration_bounds = array<i64: 1, 1>, scalar_prefetch = 0 : i64, scratch_operands = 1 : i64, tpu.core_type = #tpu.core_type<tc>, window_params = [{transform_indices = @transform_0, window_bounds = array<i64: 8, 4>}, {transform_indices = @transform_1, window_bounds = array<i64: 512, 128>}, {transform_indices = @transform_2, window_bounds = array<i64: 8, 128>}]} {
    %c0_i32 = arith.constant 0 : i32
    %0 = arith.cmpi eq, %arg1, %c0_i32 : i32
    %1 = arith.extui %0 : i1 to i32
    %c0_i32_0 = arith.constant 0 : i32
    %2 = arith.cmpi ne, %1, %c0_i32_0 : i32
    scf.if %2 {
      %cst_10 = arith.constant 0.000000e+00 : f32
      %33 = vector.broadcast %cst_10 : f32 to vector<8x128xf32>
      %c0_11 = arith.constant 0 : index
      %c0_12 = arith.constant 0 : index
      %34 = vector.load %arg5[%c0_11, %c0_12] : memref<8x128xf32, #tpu.memory_space<vmem>>, vector<8x128xf32>
      tpu.vector_store %arg5[%c0_11, %c0_12], %33 {strides = array<i32>} : memref<8x128xf32, #tpu.memory_space<vmem>>, vector<8x128xf32>,
    } else {
    }
    %c512_i32 = arith.constant 512 : i32
    %3 = arith.muli %arg1, %c512_i32 : i32
    %4 = tpu.iota {dimensions = array<i32: 1>} : vector<8x512xi32>
    %5 = vector.broadcast %3 : i32 to vector<8x512xi32>
    %6 = arith.addi %4, %5 : vector<8x512xi32>
    %c0 = arith.constant 0 : index
    %c0_1 = arith.constant 0 : index
    %7 = vector.load %arg2[%c0, %c0_1] : memref<8x4xi32, #tpu.memory_space<vmem>>, vector<8x4xi32>
    %8 = vector.extract_strided_slice %7 {offsets = [0, 0], sizes = [8, 1], strides = [1, 1]} : vector<8x4xi32> to vector<8x1xi32>
    %9 = vector.broadcast %8 : vector<8x1xi32> to vector<8x512xi32>
    %10 = arith.cmpi eq, %6, %9 : vector<8x512xi32>
    %11 = vector.extract_strided_slice %7 {offsets = [0, 1], sizes = [8, 1], strides = [1, 1]} : vector<8x4xi32> to vector<8x1xi32>
    %12 = vector.broadcast %11 : vector<8x1xi32> to vector<8x512xi32>
    %13 = arith.cmpi eq, %6, %12 : vector<8x512xi32>
    %14 = arith.ori %10, %13 : vector<8x512xi1>
    %15 = vector.extract_strided_slice %7 {offsets = [0, 2], sizes = [8, 1], strides = [1, 1]} : vector<8x4xi32> to vector<8x1xi32>
    %16 = vector.broadcast %15 : vector<8x1xi32> to vector<8x512xi32>
    %17 = arith.cmpi eq, %6, %16 : vector<8x512xi32>
    %18 = arith.ori %14, %17 : vector<8x512xi1>
    %19 = vector.extract_strided_slice %7 {offsets = [0, 3], sizes = [8, 1], strides = [1, 1]} : vector<8x4xi32> to vector<8x1xi32>
    %20 = vector.broadcast %19 : vector<8x1xi32> to vector<8x512xi32>
    %21 = arith.cmpi eq, %6, %20 : vector<8x512xi32>
    %22 = arith.ori %18, %21 : vector<8x512xi1>
    %23 = arith.extui %22 : vector<8x512xi1> to vector<8x512xi32>
    %24 = arith.sitofp %23 : vector<8x512xi32> to vector<8x512xf32>
    %c0_2 = arith.constant 0 : index
    %c0_3 = arith.constant 0 : index
    %25 = vector.load %arg5[%c0_2, %c0_3] : memref<8x128xf32, #tpu.memory_space<vmem>>, vector<8x128xf32>
    %c0_4 = arith.constant 0 : index
    %c0_5 = arith.constant 0 : index
    %26 = vector.load %arg3[%c0_4, %c0_5] : memref<512x128xf32, #tpu.memory_space<vmem>>, vector<512x128xf32>
    %cst = arith.constant dense<0.000000e+00> : vector<8x128xf32>
    %27 = tpu.matmul %24, %26, %cst {dimension_numbers = #tpu.dot_dimension_numbers<[1], [0], [0], [1], [0, 0, 1, 1], [], []>, precision = #tpu.contract_precision<fp32>} : vector<8x512xf32>, vector<512x128xf32>, vector<8x128xf32> -> vector<8x128xf32>
    %28 = arith.addf %25, %27 : vector<8x128xf32>
    %c0_6 = arith.constant 0 : index
    %c0_7 = arith.constant 0 : index
    %29 = vector.load %arg5[%c0_6, %c0_7] : memref<8x128xf32, #tpu.memory_space<vmem>>, vector<8x128xf32>
    tpu.vector_store %arg5[%c0_6, %c0_7], %28 {strides = array<i32>} : memref<8x128xf32, #tpu.memory_space<vmem>>, vector<8x128xf32>,
    %c0_i32_8 = arith.constant 0 : i32
    %30 = arith.cmpi eq, %arg1, %c0_i32_8 : i32
    %31 = arith.extui %30 : i1 to i32
    %c0_i32_9 = arith.constant 0 : i32
    %32 = arith.cmpi ne, %31, %c0_i32_9 : i32
    scf.if %32 {
      %c0_10 = arith.constant 0 : index
      %c0_11 = arith.constant 0 : index
      %33 = vector.load %arg5[%c0_10, %c0_11] : memref<8x128xf32, #tpu.memory_space<vmem>>, vector<8x128xf32>
      %c0_12 = arith.constant 0 : index
      %c0_13 = arith.constant 0 : index
      %34 = vector.load %arg4[%c0_12, %c0_13] : memref<8x128xf32, #tpu.memory_space<vmem>>, vector<8x128xf32>
      tpu.vector_store %arg4[%c0_12, %c0_13], %33 {strides = array<i32>} : memref<8x128xf32, #tpu.memory_space<vmem>>, vector<8x128xf32>,
    } else {
    }
    return
  }
  func.func @transform_0(%arg0: i32, %arg1: i32) -> (i32, i32) {
    %c0_i32 = arith.constant 0 : i32
    %c0_i32_0 = arith.constant 0 : i32
    return %arg0, %c0_i32 : i32, i32
  }
  func.func @transform_1(%arg0: i32, %arg1: i32) -> (i32, i32) {
    %c0_i32 = arith.constant 0 : i32
    %c0_i32_0 = arith.constant 0 : i32
    return %arg1, %c0_i32 : i32, i32
  }
  func.func @transform_2(%arg0: i32, %arg1: i32) -> (i32, i32) {
    %c0_i32 = arith.constant 0 : i32
    %c0_i32_0 = arith.constant 0 : i32
    return %arg0, %c0_i32 : i32, i32
  }
}

</mosaic_0001>

<bundles_post_ra>
// kernel: tpu_custom_call.1
= control target key start
LH: loop header
LB: loop body
LE: loop exit
PB: predicated region body
PF: predicated region fallthrough
CT: control target
= control target key end

     0   :  { %7 = vsyncpa [#allocation4], 0  ;;  %s4239_s0 = inlined_call_operand.vmem [shape: s32[8,4], index: 0, kind: input, shape index: {}]   ;;  %s4240_s1 = inlined_call_operand.hbm [shape: f32[512,128], index: 1, kind: input, shape index: {}]   ;;  %s4241_s2 = inlined_call_operand.hbm [shape: f32[8,128], index: 2, kind: output, shape index: {}]  }
   0x1   :  { %8 = vsyncpa [#allocation5], 0  ;;  %s2785_s9 = smov [#allocation3]   ;;  %s2737_s13 = scalar_lea.hbm %s4240_s1, 8192 }
   0x2   :  { %s16_s10 = sshll.u32 %s2785_s9, 4  ;;  %p2738_p0 = scmp.ne.s32.totalorder %s4240_s1, %s2737_s13  ;;  %s17_s10 = int_to_ptr.vmem [resolvable:$true] %s16_s10 }
   0x3   :  { %p2741_p1 = scmp.lt.u32.totalorder %s2737_s13, %s4240_s1 }
   0x5   :  { %p2743_p2 = pnand %p2741_p1, %p2738_p0 }
   0x7   :  { %2746 = shalt.err (!%p2743_p2)
}
   0x8   :  { %s2747_s18 = scalar_lea.vmem %s17_s10, 8192  ;;  %p2752_p4 = scmp.lt.s32.totalorder %s17_s10, %s17_s10 }
   0x9   :  { %p2748_p3 = scmp.ne.s32.totalorder %s17_s10, %s2747_s18  ;;  %p2753_p5 = scmp.lt.s32.totalorder %s2747_s18, %s2747_s18 }
   0xb   :  { %p2754_p6 = por %p2753_p5, %p2752_p4 }
   0xd   :  { %p2755_p7 = pnand %p2754_p6, %p2748_p3 }
   0xf   :  { %2758 = shalt.err (!%p2755_p7)
}
  0x10   :  { %s2786_s19 = smov 128   ;;  %s2787_s20 = smov 8  }
  0x11   :  { %22 = dma.hbm_to_vmem [thread:$0]  %s4240_s1, 8192, %s17_s10, [#allocation4], %s2786_s19, %s2786_s19, %s2787_s20  }
  0x12   :  { %2781 = dma.done.wait [#allocation4], 8192  }
  0x13   :  { %2782 = vsyncadd [#allocation4], 4294959104  ;;  %v2788_v0 = vmov 0   ;;  %v2789_v1 = vmov 2   ;;  %v42_v2 = vld [vmem:[%s4239_s0] sm:$0xff]  ;;  %v2827_v4 = vld [vmem:[#allocation3 + $0x88] sm:$0xff] }
  0x14   :  { %2732 = vset.pattern.permute.xlu0 %v2788_v0  ;;  %2734 = vset.pattern.permute.xlu1 %v2789_v1  ;;  %v2825_v3 = vld [vmem:[#allocation3 + $0x80] sm:$0xff]  ;;  %v208_v6 = vand.u32 4294901760, %v2827_v4  ;;  %v2833_v8 = vld [vmem:[#allocation3 + $0x8] sm:$0xff]  ;;  %v2835_v9 = vld [vmem:[#allocation3 + $0x90] sm:$0xff]  ;;  %v2790_v24 = vmov 1   ;;  %v2791_v25 = vmov 3  }
  0x15   :  { %44 = vperm.xlu0 %2732, %v42_v2   ;;  %62 = vperm.xlu1 %2734, %v42_v2   ;;  %v205_v5 = vand.u32 4294901760, %v2825_v3  ;;  %v2831_v7 = vld [vmem:[#allocation3] sm:$0xff]  ;;  %v160_v11 = vand.u32 4294901760, %v2833_v8  ;;  %v2839_v12 = vld [vmem:[#allocation3 + $0x98] sm:$0xff]  ;;  %v211_v13 = vand.u32 4294901760, %v2835_v9  ;;  %v2842_v14 = vld [vmem:[#allocation3 + $0x10] sm:$0xff] }
  0x16   :  { %v157_v10 = vand.u32 4294901760, %v2831_v7  ;;  %v2844_v15 = vld [vmem:[#allocation3 + $0x18] sm:$0xff]  ;;  %v2850_v17 = vsub.f32 %v2827_v4, %v208_v6  ;;  %v214_v18 = vand.u32 4294901760, %v2839_v12  ;;  %v163_v19 = vand.u32 4294901760, %v2842_v14  ;;  %v2908_v42 = vld [vmem:[#allocation3 + $0xa0] sm:$0xff]  ;;  %v2916_v47 = vld [vmem:[#allocation3 + $0xa8] sm:$0xff] }
  0x17   :  { %v2847_v16 = vsub.f32 %v2825_v3, %v205_v5  ;;  %v2862_v21 = vsub.f32 %v2833_v8, %v160_v11  ;;  %v2867_v22 = vsub.f32 %v2835_v9, %v211_v13  ;;  %v166_v23 = vand.u32 4294901760, %v2844_v15  ;;  %v2921_v52 = vld [vmem:[#allocation3 + $0x20] sm:$0xff]  ;;  %v2923_v53 = vld [vmem:[#allocation3 + $0x28] sm:$0xff]  ;;  %v2926_v58 = vld [vmem:[#allocation3 + $0xb0] sm:$0xff]  ;;  %s2794_s0 = smov [#allocation6]  }
  0x18   :  { %v2857_v20 = vsub.f32 %v2831_v7, %v157_v10  ;;  %v4260_v27 = vand.u32 4294901760, %v2850_v17  ;;  %v2875_v28 = vsub.f32 %v2839_v12, %v214_v18  ;;  %v2880_v29 = vsub.f32 %v2842_v14, %v163_v19  ;;  %v2931_v63 = vld [vmem:[#allocation3 + $0xb8] sm:$0xff]  ;;  %v2940_v4 = vld [vmem:[#allocation3 + $0x30] sm:$0xff]  ;;  %s1893_s1 = sshll.u32 %s2794_s0, 4  ;;  %s1894_s1 = int_to_ptr.vmem [resolvable:$true] %s1893_s1 }
  0x19   :  { %2733 = vset.pattern.permute.xlu0 %v2790_v24  ;;  %2735 = vset.pattern.permute.xlu1 %v2791_v25  ;;  %v4262_v26 = vand.u32 4294901760, %v2847_v16  ;;  %v4256_v31 = vand.u32 4294901760, %v2862_v21  ;;  %v4255_v32 = vand.u32 4294901760, %v2867_v22  ;;  %v2888_v33 = vsub.f32 %v2844_v15, %v166_v23  ;;  %v2967_v8 = vld [vmem:[#allocation3 + $0x38] sm:$0xff]  ;;  %s2759_s25 = scalar_lea.vmem %s1894_s1, 128  ;;  %p2764_p9 = scmp.lt.s32.totalorder %s1894_s1, %s1894_s1 }
  0x1a   :  { %51 = vperm.xlu0 %2733, %v42_v2   ;;  %73 = vperm.xlu1 %2735, %v42_v2   ;;  %v4258_v30 = vand.u32 4294901760, %v2857_v20  ;;  %v391_v35 = vsub.f32 %v2850_v17, %v4260_v27  ;;  %v4254_v36 = vand.u32 4294901760, %v2875_v28  ;;  %v4251_v37 = vand.u32 4294901760, %v2880_v29  ;;  %p2760_p8 = scmp.ne.s32.totalorder %s1894_s1, %s2759_s25  ;;  %p2765_p10 = scmp.lt.s32.totalorder %s2759_s25, %s2759_s25 }
  0x1b   :  { %v384_v34 = vsub.f32 %v2847_v16, %v4262_v26  ;;  %v279_v39 = vsub.f32 %v2862_v21, %v4256_v31  ;;  %v398_v40 = vsub.f32 %v2867_v22, %v4255_v32  ;;  %v4247_v41 = vand.u32 4294901760, %v2888_v33  ;;  %v3130_v32 = vld [vmem:[#allocation3 + $0xe0] sm:$0xff] }
  0x1c   :  { %v272_v38 = vsub.f32 %v2857_v20, %v4258_v30  ;;  %v392_v44 = vand.u32 4294901760, %v391_v35  ;;  %v405_v45 = vsub.f32 %v2875_v28, %v4254_v36  ;;  %v286_v46 = vsub.f32 %v2880_v29, %v4251_v37  ;;  %v3156_v26 = vld [vmem:[#allocation3 + $0x60] sm:$0xff]  ;;  %p2766_p11 = por %p2765_p10, %p2764_p9 }
  0x1d   :  { %v385_v43 = vand.u32 4294901760, %v384_v34  ;;  %v280_v49 = vand.u32 4294901760, %v279_v39  ;;  %v399_v50 = vand.u32 4294901760, %v398_v40  ;;  %v293_v51 = vsub.f32 %v2888_v33, %v4247_v41 }
  0x1e   :  { %v273_v48 = vand.u32 4294901760, %v272_v38  ;;  %2736 = vset.pattern.permute.xlu0 %v2791_v25  ;;  %v406_v55 = vand.u32 4294901760, %v405_v45  ;;  %v287_v56 = vand.u32 4294901760, %v286_v46  ;;  %v217_v57 = vand.u32 4294901760, %v2908_v42  ;;  %p2767_p12 = pnand %p2766_p11, %p2760_p8 }
  0x1f   :  { %v2370_v54 = vpack.c.bf16 %v392_v44, %v385_v43  ;;  %v294_v60 = vand.u32 4294901760, %v293_v51  ;;  %v220_v61 = vand.u32 4294901760, %v2916_v47  ;;  %v2929_v62 = vpack.c.bf16 %v208_v6, %v205_v5 }
  0x20   :  { %v2372_v59 = vpack.c.bf16 %v280_v49, %v273_v48  ;;  %v2374_v0 = vpack.c.bf16 %v406_v55, %v399_v50  ;;  %v2936_v1 = vsub.f32 %v2908_v42, %v217_v57  ;;  %v169_v2 = vand.u32 4294901760, %v2921_v52 }
  0x21   :  { %2371 = vmatprep.subr.bf16.mxu1 %v2370_v54  ;;  %v172_v3 = vand.u32 4294901760, %v2923_v53  ;;  %v2376_v24 = vpack.c.bf16 %v294_v60, %v287_v56  ;;  %v2945_v5 = vsub.f32 %v2916_v47, %v220_v61  ;;  %2339 = vmatprep.subr.bf16.mxu0 %v2929_v62  ;;  %v2952_v6 = vpack.c.bf16 %v160_v11, %v157_v10  ;;  %v3020_v60 = vld [vmem:[#allocation3 + $0xc0] sm:$0xff] }
  0x22   :  { %2373 = vmatpush3.bf16.msra.mxu1 %v2372_v59  ;;  %v223_v25 = vand.u32 4294901760, %v2926_v58  ;;  %v4246_v34 = vand.u32 4294901760, %v2936_v1  ;;  %v2959_v35 = vsub.f32 %v2921_v52, %v169_v2  ;;  %v226_v7 = vand.u32 4294901760, %v2931_v63  ;;  %v3092_v52 = vld [vmem:[#allocation3 + $0x58] sm:$0xff] }
  0x23   :  { %2375 = vmatprep.subr.bf16.mxu1 %v2374_v0  ;;  %v2964_v38 = vsub.f32 %v2923_v53, %v172_v3  ;;  %v4245_v10 = vand.u32 4294901760, %v2945_v5  ;;  %2341 = vmatpush3.bf16.msra.mxu0 %v2952_v6  ;;  %v2980_v39 = vpack.c.bf16 %v214_v18, %v211_v13  ;;  %v175_v40 = vand.u32 4294901760, %v2940_v4  ;;  %v3022_v0 = vld [vmem:[#allocation3 + $0xc8] sm:$0xff] }
  0x24   :  { %v2974_v11 = vsub.f32 %v2926_v58, %v223_v25  ;;  %v412_v43 = vsub.f32 %v2936_v1, %v4246_v34  ;;  %v4244_v44 = vand.u32 4294901760, %v2959_v35  ;;  %v2991_v46 = vsub.f32 %v2931_v63, %v226_v7 }
  0x25   :  { %v4243_v45 = vand.u32 4294901760, %v2964_v38  ;;  %v419_v9 = vsub.f32 %v2945_v5, %v4245_v10  ;;  %2343 = vmatprep.subr.bf16.mxu0 %v2980_v39  ;;  %v178_v13 = vand.u32 4294901760, %v2967_v8  ;;  %v3002_v18 = vsub.f32 %v2940_v4, %v175_v40 }
  0x26   :  { %2377 = vmatpush3.bf16.msra.mxu1 %v2376_v24  ;;  %v4242_v12 = vand.u32 4294901760, %v2974_v11  ;;  %v413_v48 = vand.u32 4294901760, %v412_v43  ;;  %v300_v49 = vsub.f32 %v2959_v35, %v4244_v44  ;;  %v4248_v51 = vand.u32 4294901760, %v2991_v46 }
  0x27   :  { %v307_v50 = vsub.f32 %v2964_v38, %v4243_v45  ;;  %v420_v54 = vand.u32 4294901760, %v419_v9  ;;  %v4250_v56 = vand.u32 4294901760, %v3002_v18  ;;  %v3018_v59 = vsub.f32 %v2967_v8, %v178_v13  ;;  %v3033_v45 = vld [vmem:[#allocation3 + $0x40] sm:$0xff] }
  0x28   :  { %v426_v55 = vsub.f32 %v2974_v11, %v4242_v12  ;;  %v301_v24 = vand.u32 4294901760, %v300_v49  ;;  %v433_v9 = vsub.f32 %v2991_v46, %v4248_v51  ;;  %v3031_v12 = vpack.c.bf16 %v166_v23, %v163_v19  ;;  %v3044_v19 = vld [vmem:[#allocation3 + $0xd0] sm:$0xff] }
  0x29   :  { %v308_v43 = vand.u32 4294901760, %v307_v50  ;;  %v2378_v44 = vpack.c.bf16 %v420_v54, %v413_v48  ;;  %v314_v34 = vsub.f32 %v3002_v18, %v4250_v56  ;;  %v4249_v49 = vand.u32 4294901760, %v3018_v59  ;;  %v3039_v50 = vld [vmem:[#allocation3 + $0x48] sm:$0xff] }
  0x2a   :  { %v427_v10 = vand.u32 4294901760, %v426_v55  ;;  %v434_v51 = vand.u32 4294901760, %v433_v9  ;;  %2345 = vmatpush3.bf16.msra.mxu0 %v3031_v12  ;;  %v229_v14 = vand.u32 4294901760, %v3020_v60  ;;  %v232_v15 = vand.u32 4294901760, %v3022_v0 }
  0x2b   :  { %v2380_v41 = vpack.c.bf16 %v308_v43, %v301_v24  ;;  %2379 = vmatprep.subr.bf16.mxu1 %v2378_v44  ;;  %v315_v23 = vand.u32 4294901760, %v314_v34  ;;  %v321_v48 = vsub.f32 %v3018_v59, %v4249_v49  ;;  %v3053_v54 = vpack.c.bf16 %v220_v61, %v217_v57  ;;  %v3056_v24 = vld [vmem:[#allocation3 + $0xd8] sm:$0xff]  ;;  %v3090_v49 = vld [vmem:[#allocation3 + $0x50] sm:$0xff] }
  0x2c   :  { %v181_v55 = vand.u32 4294901760, %v3033_v45  ;;  %v2382_v43 = vpack.c.bf16 %v434_v51, %v427_v10  ;;  %v3061_v34 = vsub.f32 %v3020_v60, %v229_v14  ;;  %v3066_v44 = vsub.f32 %v3022_v0, %v232_v15  ;;  %v122_v60 = vld [vmem:[#allocation3 + $0xf0] sm:$0xff] }
  0x2d   :  { %4363 = vst [vmem:[#allocation9_spill] sm:$0xff] %v3053_v54  ;;  %2381 = vmatpush3.bf16.msra.mxu1 %v2380_v41  ;;  %v184_v42 = vand.u32 4294901760, %v3039_v50  ;;  %v322_v47 = vand.u32 4294901760, %v321_v48  ;;  %2347 = vmatprep.subr.bf16.mxu0 %v3053_v54  ;;  %v3079_v57 = vpack.c.bf16 %v172_v3, %v169_v2  ;;  %v235_v61 = vand.u32 4294901760, %v3044_v19 }
  0x2e   :  { %v3073_v41 = vsub.f32 %v3033_v45, %v181_v55  ;;  %2383 = vmatprep.subr.bf16.mxu1 %v2382_v43  ;;  %v4253_v10 = vand.u32 4294901760, %v3061_v34  ;;  %v4252_v51 = vand.u32 4294901760, %v3066_v44  ;;  %v4265_v48 = vand.u32 4294901760, %v3056_v24 }
  0x2f   :  { %4364 = vst [vmem:[#allocation10_spill] sm:$0xff] %v3079_v57  ;;  %v3087_v9 = vsub.f32 %v3039_v50, %v184_v42  ;;  %v2384_v53 = vpack.c.bf16 %v322_v47, %v315_v23  ;;  %2349 = vmatpush3.bf16.msra.mxu0 %v3079_v57  ;;  %v3099_v3 = vsub.f32 %v3044_v19, %v235_v61  ;;  %v247_v45 = vand.u32 4294901760, %v122_v60  ;;  %v106_v50 = vld [vmem:[#allocation3 + $0x70] sm:$0xff] }
  0x30   :  { %v4257_v2 = vand.u32 4294901760, %v3073_v41  ;;  %v3105_v43 = vpack.c.bf16 %v226_v7, %v223_v25  ;;  %v440_v56 = vsub.f32 %v3061_v34, %v4253_v10  ;;  %v447_v23 = vsub.f32 %v3066_v44, %v4252_v51 }
  0x31   :  { %v4259_v47 = vand.u32 4294901760, %v3087_v9  ;;  %v3117_v37 = vsub.f32 %v3056_v24, %v4265_v48  ;;  %2385 = vmatpush3.bf16.msra.mxu1 %v2384_v53  ;;  %v4261_v63 = vand.u32 4294901760, %v3099_v3  ;;  %v4263_v25 = vand.u32 4294901760, %v3090_v49 }
  0x32   :  { %4365 = vst [vmem:[#allocation11_spill] sm:$0xff] %v3105_v43  ;;  %v328_v58 = vsub.f32 %v3073_v41, %v4257_v2  ;;  %2351 = vmatprep.subr.bf16.mxu0 %v3105_v43  ;;  %v4264_v7 = vand.u32 4294901760, %v3092_v52  ;;  %v441_v51 = vand.u32 4294901760, %v440_v56  ;;  %v448_v10 = vand.u32 4294901760, %v447_v23  ;;  %v3145_v23 = vld [vmem:[#allocation3 + $0xe8] sm:$0xff] }
  0x33   :  { %v335_v36 = vsub.f32 %v3087_v9, %v4259_v47  ;;  %v4266_v53 = vand.u32 4294901760, %v3117_v37  ;;  %v454_v2 = vsub.f32 %v3099_v3, %v4261_v63  ;;  %v3138_v30 = vsub.f32 %v3090_v49, %v4263_v25 }
  0x34   :  { %v329_v31 = vand.u32 4294901760, %v328_v58  ;;  %v3143_v56 = vsub.f32 %v3092_v52, %v4264_v7  ;;  %v2386_v47 = vpack.c.bf16 %v448_v10, %v441_v51  ;;  %v3154_v63 = vpack.c.bf16 %v178_v13, %v175_v40 }
  0x35   :  { %v336_v27 = vand.u32 4294901760, %v335_v36  ;;  %v461_v58 = vsub.f32 %v3117_v37, %v4266_v53  ;;  %v455_v25 = vand.u32 4294901760, %v454_v2  ;;  %v4268_v7 = vand.u32 4294901760, %v3138_v30  ;;  %v3161_v36 = vld [vmem:[#allocation3 + $0x68] sm:$0xff]  ;;  %v123_v2 = vld [vmem:[#allocation3 + $0xf8] sm:$0xff] }
  0x36   :  { %4366 = vst [vmem:[#allocation12_spill] sm:$0xff] %v3154_v63  ;;  %v4267_v48 = vand.u32 4294901760, %v3143_v56  ;;  %v4269_v10 = vand.u32 4294901760, %v3130_v32  ;;  %2387 = vmatprep.subr.bf16.mxu1 %v2386_v47  ;;  %2353 = vmatpush3.bf16.msra.mxu0 %v3154_v63  ;;  %v244_v4 = vand.u32 4294901760, %v3145_v23  ;;  %v3169_v8 = vpack.c.bf16 %v232_v15, %v229_v14 }
  0x37   :  { %v2388_v51 = vpack.c.bf16 %v336_v27, %v329_v31  ;;  %v462_v53 = vand.u32 4294901760, %v461_v58  ;;  %v342_v40 = vsub.f32 %v3138_v30, %v4268_v7  ;;  %v193_v31 = vand.u32 4294901760, %v3156_v26 }
  0x38   :  { %4367 = vst [vmem:[#allocation13_spill] sm:$0xff] %v3169_v8  ;;  %v349_v13 = vsub.f32 %v3143_v56, %v4267_v48  ;;  %v3180_v27 = vsub.f32 %v3130_v32, %v4269_v10  ;;  %v3184_v14 = vsub.f32 %v3145_v23, %v244_v4  ;;  %2355 = vmatprep.subr.bf16.mxu0 %v3169_v8  ;;  %v196_v15 = vand.u32 4294901760, %v3161_v36 }
  0x39   :  { %2389 = vmatpush3.bf16.msra.mxu1 %v2388_v51  ;;  %v2390_v0 = vpack.c.bf16 %v462_v53, %v455_v25  ;;  %v3192_v47 = vpack.c.bf16 %v184_v42, %v181_v55  ;;  %v343_v58 = vand.u32 4294901760, %v342_v40  ;;  %v3196_v51 = vsub.f32 %v3156_v26, %v193_v31  ;;  %v107_v55 = vld [vmem:[#allocation3 + $0x78] sm:$0xff] }
  0x3a   :  { %v350_v48 = vand.u32 4294901760, %v349_v13  ;;  %v4273_v7 = vand.u32 4294901760, %v3180_v27  ;;  %v4272_v25 = vand.u32 4294901760, %v3184_v14  ;;  %v3200_v53 = vsub.f32 %v3161_v36, %v196_v15 }
  0x3b   :  { %4368 = vst [vmem:[#allocation14_spill] sm:$0xff] %v3192_v47  ;;  %2391 = vmatprep.subr.bf16.mxu1 %v2390_v0  ;;  %2357 = vmatpush3.bf16.msra.mxu0 %v3192_v47  ;;  %v250_v23 = vand.u32 4294901760, %v123_v2  ;;  %v4276_v26 = vand.u32 4294901760, %v3196_v51  ;;  %v4369_v13 = vand.u32 4294901760, %v3056_v24  ;;  %v3217_v47 = vsub.f32 %v122_v60, %v247_v45 }
  0x3c   :  { %v2392_v42 = vpack.c.bf16 %v350_v48, %v343_v58  ;;  %v468_v40 = vsub.f32 %v3180_v27, %v4273_v7  ;;  %v475_v36 = vsub.f32 %v3184_v14, %v4272_v25  ;;  %v4279_v10 = vand.u32 4294901760, %v3200_v53 }
  0x3d   :  { %v3211_v0 = vpack.c.bf16 %v4369_v13, %v235_v61  ;;  %v3219_v48 = vsub.f32 %v123_v2, %v250_v23  ;;  %v356_v19 = vsub.f32 %v3196_v51, %v4276_v26  ;;  %v199_v24 = vand.u32 4294901760, %v106_v50 }
  0x3e   :  { %2393 = vmatpush3.bf16.msra.mxu1 %v2392_v42  ;;  %v469_v58 = vand.u32 4294901760, %v468_v40  ;;  %v202_v61 = vand.u32 4294901760, %v107_v55  ;;  %v476_v13 = vand.u32 4294901760, %v475_v36  ;;  %v363_v25 = vsub.f32 %v3200_v53, %v4279_v10 }
  0x3f   :  { %4370 = vst [vmem:[#allocation15_spill] sm:$0xff] %v3211_v0  ;;  %2359 = vmatprep.subr.bf16.mxu0 %v3211_v0  ;;  %v4282_v60 = vand.u32 4294901760, %v3217_v47  ;;  %v4285_v2 = vand.u32 4294901760, %v3219_v48  ;;  %v357_v7 = vand.u32 4294901760, %v356_v19  ;;  %v3230_v42 = vsub.f32 %v106_v50, %v199_v24 }
  0x40   :  { %v3232_v40 = vsub.f32 %v107_v55, %v202_v61  ;;  %v2394_v8 = vpack.c.bf16 %v476_v13, %v469_v58  ;;  %v364_v26 = vand.u32 4294901760, %v363_v25  ;;  %v4371_v19 = vand.u32 4294901760, %v3090_v49 }
  0x41   :  { %v482_v0 = vsub.f32 %v3217_v47, %v4282_v60  ;;  %v489_v36 = vsub.f32 %v3219_v48, %v4285_v2  ;;  %v369_v10 = vand.u32 4294901760, %v3230_v42  ;;  %v4372_v50 = vand.u32 4294901760, %v3092_v52 }
  0x42   :  { %v376_v63 = vand.u32 4294901760, %v3232_v40  ;;  %2395 = vmatprep.subr.bf16.mxu1 %v2394_v8  ;;  %v2396_v25 = vpack.c.bf16 %v364_v26, %v357_v7  ;;  %v4373_v60 = vand.u32 4294901760, %v3130_v32  ;;  %v3255_v54 = vpack.c.bf16 %v196_v15, %v193_v31 }
  0x43   :  { %v3246_v55 = vpack.c.bf16 %v4372_v50, %v4371_v19  ;;  %v483_v58 = vand.u32 4294901760, %v482_v0  ;;  %v490_v13 = vand.u32 4294901760, %v489_v36  ;;  %v370_v2 = vsub.f32 %v3230_v42, %v369_v10 }
  0x44   :  { %v3250_v43 = vpack.c.bf16 %v244_v4, %v4373_v60  ;;  %v377_v57 = vsub.f32 %v3232_v40, %v376_v63  ;;  %v3257_v49 = vpack.c.bf16 %v250_v23, %v247_v45  ;;  %2397 = vmatpush3.bf16.msra.mxu1 %v2396_v25  ;;  %v3260_v7 = vpack.c.bf16 %v202_v61, %v199_v24 }
  0x45   :  { %2361 = vmatpush3.bf16.msra.mxu0 %v3246_v55  ;;  %v2398_v52 = vpack.c.bf16 %v490_v13, %v483_v58  ;;  %v2402_v32 = vpack.c.bf16 %v2850_v17, %v2847_v16  ;;  %v371_v4 = vand.u32 4294901760, %v370_v2  ;;  %v4374_v13 = vand.u32 4294901760, %v2847_v16 }
  0x46   :  { %2363 = vmatprep.subr.bf16.mxu0 %v3250_v43  ;;  %v378_v8 = vand.u32 4294901760, %v377_v57  ;;  %v4378_v25 = vand.u32 4294901760, %v2867_v22  ;;  %v4379_v58 = vand.u32 4294901760, %v2875_v28  ;;  %v4380_v36 = vand.u32 4294901760, %v2880_v29 }
  0x47   :  { %2399 = vmatprep.subr.bf16.mxu1 %v2398_v52  ;;  %v4375_v52 = vand.u32 4294901760, %v2850_v17  ;;  %v4381_v16 = vand.u32 4294901760, %v2888_v33 }
  0x48   :  { %v2400_v57 = vpack.c.bf16 %v378_v8, %v371_v4  ;;  %v4376_v8 = vand.u32 4294901760, %v2857_v20  ;;  %v3314_v19 = vpack.c.bf16 %v4379_v58, %v4378_v25  ;;  %v4386_v25 = vand.u32 4294901760, %v2974_v11 }
  0x49   :  { %2365 = vmatpush3.bf16.msra.mxu0 %v3255_v54  ;;  %v3302_v4 = vpack.c.bf16 %v4375_v52, %v4374_v13  ;;  %v3320_v17 = vpack.c.bf16 %v4381_v16, %v4380_v36  ;;  %v4383_v13 = vand.u32 4294901760, %v2945_v5  ;;  %v4387_v58 = vand.u32 4294901760, %v2991_v46 }
  0x4a   :  { %2367 = vmatprep.subr.bf16.mxu0 %v3257_v49  ;;  %2401 = vmatpush3.bf16.msra.mxu1 %v2400_v57  ;;  %v4377_v57 = vand.u32 4294901760, %v2862_v21  ;;  %v4388_v36 = vand.u32 4294901760, %v3002_v18  ;;  %v4389_v16 = vand.u32 4294901760, %v3018_v59 }
  0x4b   :  { %2435 = vmatprep.subr.bf16.mxu1 %v2929_v62  ;;  %v3338_v60 = vpack.c.bf16 %v4387_v58, %v4386_v25  ;;  %v4396_v25 = vand.u32 4294901760, %v3099_v3  ;;  %v4397_v58 = vand.u32 4294901760, %v3117_v37 }
  0x4c   :  { %v3308_v50 = vpack.c.bf16 %v4377_v57, %v4376_v8  ;;  %v4384_v8 = vand.u32 4294901760, %v2959_v35  ;;  %v4385_v57 = vand.u32 4294901760, %v2964_v38  ;;  %v3344_v61 = vpack.c.bf16 %v4389_v16, %v4388_v36 }
  0x4d   :  { %2369 = vmatpush3.bf16.msra.mxu0 %v3260_v7  ;;  %v3362_v23 = vpack.c.bf16 %v4397_v58, %v4396_v25  ;;  %v4399_v36 = vand.u32 4294901760, %v3138_v30  ;;  %v4400_v16 = vand.u32 4294901760, %v3143_v56  ;;  %v4407_v25 = vand.u32 4294901760, %v3217_v47 }
  0x4e   :  { %2403 = vmatprep.subr.bf16.mxu0 %v2402_v32  ;;  %v4382_v32 = vand.u32 4294901760, %v2936_v1  ;;  %v3332_v2 = vpack.c.bf16 %v4385_v57, %v4384_v8  ;;  %v4393_v8 = vand.u32 4294901760, %v3073_v41  ;;  %v4394_v57 = vand.u32 4294901760, %v3087_v9 }
  0x4f   :  { %4398 = vst [vmem:[#allocation18_spill] sm:$0xff] %v3362_v23  ;;  %v3368_v45 = vpack.c.bf16 %v4400_v16, %v4399_v36  ;;  %v4408_v58 = vand.u32 4294901760, %v3219_v48  ;;  %v3388_v36 = vpack.c.bf16 %v376_v63, %v369_v10  ;;  %v32_v16 = vlaneseq }
  0x50   :  { %v3326_v52 = vpack.c.bf16 %v4383_v13, %v4382_v32  ;;  %v4390_v32 = vand.u32 4294901760, %v3061_v34  ;;  %v4391_v13 = vand.u32 4294901760, %v3066_v44  ;;  %v3356_v0 = vpack.c.bf16 %v4394_v57, %v4393_v8 }
  0x51   :  { %4401 = vst [vmem:[#allocation19_spill] sm:$0xff] %v3368_v45  ;;  %v4405_v8 = vand.u32 4294901760, %v3196_v51  ;;  %v4406_v57 = vand.u32 4294901760, %v3200_v53  ;;  %v3386_v26 = vpack.c.bf16 %v4408_v58, %v4407_v25  ;;  %4409 = vst [vmem:[#allocation21_spill] sm:$0xff] %v3388_v36  ;;  %v33_v45 = vand.u32 127, %v32_v16  ;;  %v4430_v36 = vld [vmem:[#allocation12_spill] sm:$0xff] }
  0x52   :  { %v3350_v24 = vpack.c.bf16 %v4391_v13, %v4390_v32  ;;  %4395 = vst [vmem:[#allocation17_spill] sm:$0xff] %v3356_v0  ;;  %v4402_v32 = vand.u32 4294901760, %v3180_v27  ;;  %v4403_v13 = vand.u32 4294901760, %v3184_v14  ;;  %v4414_v10 = vmov 0 }
  0x53   :  { %v3380_v31 = vpack.c.bf16 %v4406_v57, %v4405_v8  ;;  %v4410_v57 = vmov 0  ;;  %v4292_v58 = vmov 1.0  }
  0x54   :  { %4392 = vst [vmem:[#allocation16_spill] sm:$0xff] %v3350_v24  ;;  %v3374_v15 = vpack.c.bf16 %v4403_v13, %v4402_v32  ;;  %v34_v32 = vadd.s32 128, %v33_v45  ;;  %v35_v13 = vadd.s32 256, %v33_v45 }
  0x56   :  { %4404 = vst [vmem:[#allocation20_spill] sm:$0xff] %v3374_v15  ;;  %v36_v15 = vadd.s32 384, %v33_v45 }
  0x94   :  { %v45_v23 = vpop.permute.xlu0 %44  ;;  %v63_v0 = vpop.permute.xlu1 %62 }
  0x95   :  { %vm46_vm0 = vcmp.eq.s32.totalorder %v33_v45, %v45_v23  ;;  %vm47_vm4 = vcmp.eq.s32.totalorder %v34_v32, %v45_v23  ;;  %vm48_vm7 = vcmp.eq.s32.totalorder %v35_v13, %v45_v23  ;;  %vm49_vm9 = vcmp.eq.s32.totalorder %v36_v15, %v45_v23 }
  0x96   :  { %vm66_vm12 = vcmp.eq.s32.totalorder %v35_v13, %v63_v0  ;;  %v4290_v23 = vmov 0.0  }
  0x99   :  { %v52_v24 = vpop.permute.xlu0 %51  ;;  %v74_v8 = vpop.permute.xlu1 %73 }
  0x9a   :  { %vm53_vm1 = vcmp.eq.s32.totalorder %v33_v45, %v52_v24  ;;  %vm54_vm2 = vcmp.eq.s32.totalorder %v34_v32, %v52_v24  ;;  %vm55_vm3 = vcmp.eq.s32.totalorder %v35_v13, %v52_v24  ;;  %vm56_vm5 = vcmp.eq.s32.totalorder %v36_v15, %v52_v24  ;;  %v3685_v24 = vld [vmem:[#allocation3 + $0x128] sm:$0xff] }
  0x9b   :  { %vm3390_vm6 = vmor %vm46_vm0, %vm53_vm1  ;;  %vm77_vm11 = vcmp.eq.s32.totalorder %v35_v13, %v74_v8  ;;  %vm76_vm15 = vcmp.eq.s32.totalorder %v34_v32, %v74_v8  ;;  %vm65_vm1 = vcmp.eq.s32.totalorder %v34_v32, %v63_v0 }
  0x9c   :  { %v4411_v57 = vsel %vm3390_vm6, 4294967295, %v4410_v57  ;;  %vm58_vm8 = vmor %vm47_vm4, %vm54_vm2  ;;  %vm75_vm6 = vcmp.eq.s32.totalorder %v33_v45, %v74_v8 }
  0x9d   :  { %vm59_vm10 = vmor %vm48_vm7, %vm55_vm3  ;;  %vm64_vm3 = vcmp.eq.s32.totalorder %v33_v45, %v63_v0  ;;  %vm78_vm7 = vcmp.eq.s32.totalorder %v36_v15, %v74_v8  ;;  %v4426_v8 = vld [vmem:[#allocation10_spill] sm:$0xff] }
  0x9e   :  { %vm3394_vm13 = vmor %vm49_vm9, %vm56_vm5  ;;  %vm4419_vm5 = vnez %v4411_v57 }
  0x9f   :  { %vm70_vm14 = vmor %vm59_vm10, %vm66_vm12  ;;  %vm67_vm10 = vcmp.eq.s32.totalorder %v36_v15, %v63_v0 }
  0xa0   :  { %vm3398_vm0 = vmor %vm70_vm14, %vm77_vm11 }
  0xa1   :  { %v4415_v10 = vsel %vm3398_vm0, 4294967295, %v4414_v10  ;;  %vm69_vm2 = vmor %vm58_vm8, %vm65_vm1 }
  0xa2   :  { %4416 = vst [vmem:[#allocation22_spill] sm:$0xff] %v4415_v10  ;;  %vm3402_vm4 = vmor %vm69_vm2, %vm76_vm15  ;;  %v4427_v10 = vpack.c.bf16 %v2862_v21, %v2857_v20  ;;  %v4434_v20 = vld [vmem:[#allocation14_spill] sm:$0xff]  ;;  %v4435_v21 = vpack.c.bf16 %v2964_v38, %v2959_v35  ;;  %v4442_v35 = vpack.c.bf16 %v3018_v59, %v3002_v18 }
  0xa3   :  { %v1903_v25 = vsel %vm3402_vm4, 1.0, %v4290_v23  ;;  %1906 = vmatprep.mubr.msk.f32.mxu1 %vm3402_vm4, %v4292_v58  ;;  %vm68_vm9 = vmor %vm4419_vm5, %vm64_vm3 }
  0xa4   :  { %v253_v16 = vsub.f32 %v1903_v25, %v1903_v25  ;;  %vm3414_vm8 = vmor %vm68_vm9, %vm75_vm6  ;;  %v4422_v25 = vmov 0 }
  0xa5   :  { %v1902_v45 = vsel %vm3414_vm8, 1.0, %v4290_v23  ;;  %1907 = vmatmul.mubr.msk.f32.vlgmr.msra.gmra.mrb[0].mxu1 %vm3414_vm8, %v4292_v58  ;;  %vm71_vm11 = vmor %vm3394_vm13, %vm67_vm10  ;;  %v4425_v58 = vld [vmem:[#allocation9_spill] sm:$0xff] }
  0xa6   :  { %v3426_v13 = vsub.f32 %v1902_v45, %v1902_v45  ;;  %2437 = vmatpush3.bf16.msra.mxu1 %v2952_v6  ;;  %v254_v57 = vand.u32 4294901760, %v253_v16  ;;  %vm3430_vm6 = vmor %vm71_vm11, %vm78_vm7 }
  0xa7   :  { %v4423_v25 = vsel %vm3430_vm6, 4294967295, %v4422_v25  ;;  %2439 = vmatprep.subr.bf16.mxu1 %v2980_v39 }
  0xa8   :  { %4424 = vst [vmem:[#allocation23_spill] sm:$0xff] %v4423_v25  ;;  %737 = vmatprep.mubr.f32.mxu1 %v254_v57  ;;  %v255_v0 = vsub.f32 %v253_v16, %v254_v57  ;;  %v4300_v23 = vand.u32 4294901760, %v3426_v13  ;;  %v4428_v57 = vld [vmem:[#allocation11_spill] sm:$0xff] }
  0xaa   :  { %2441 = vmatpush3.bf16.msra.mxu1 %v3031_v12  ;;  %v256_v63 = vand.u32 4294901760, %v255_v0  ;;  %v261_v45 = vsub.f32 %v3426_v13, %v4300_v23  ;;  %v4429_v0 = vpack.c.bf16 %v2875_v28, %v2867_v22  ;;  %v4436_v22 = vld [vmem:[#allocation15_spill] sm:$0xff]  ;;  %v4437_v28 = vpack.c.bf16 %v2991_v46, %v2974_v11  ;;  %v3480_v46 = vld [vmem:[#allocation3 + $0x170] sm:$0xff] }
  0xab   :  { %2443 = vmatprep.subr.bf16.mxu1 %v4425_v58  ;;  %v4301_v18 = vand.u32 4294901760, %v3480_v46  ;;  %v3549_v23 = vld [vmem:[#allocation3 + $0x118] sm:$0xff] }
  0xac   :  { %257 = vmatprep.mubr.f32.mxu0 %v256_v63  ;;  %v262_v15 = vand.u32 4294901760, %v261_v45  ;;  %v4431_v63 = vpack.c.bf16 %v2888_v33, %v2880_v29  ;;  %v4432_v45 = vld [vmem:[#allocation13_spill] sm:$0xff]  ;;  %v3465_v29 = vld [vmem:[#allocation3 + $0x160] sm:$0xff] }
  0xad   :  { %4438 = vst [vmem:[#allocation9_spill] sm:$0xff] %v3465_v29  ;;  %v3467_v33 = vld [vmem:[#allocation3 + $0x168] sm:$0xff]  ;;  %v4299_v38 = vand.u32 4294901760, %v3465_v29  ;;  %4443 = vst [vmem:[#allocation13_spill] sm:$0xff] %v3480_v46 }
  0xae   :  { %2445 = vmatpush3.bf16.msra.mxu1 %v4426_v8  ;;  %263 = vmatmul.mubr.f32.vlgmr.msra.gmra.mrb[0].mxu0 %v262_v15  ;;  %v4433_v15 = vpack.c.bf16 %v2945_v5, %v2936_v1  ;;  %4439 = vst [vmem:[#allocation10_spill] sm:$0xff] %v3467_v33  ;;  %v3470_v1 = vld [vmem:[#allocation3 + $0x1f0] sm:$0xff]  ;;  %v3472_v5 = vld [vmem:[#allocation3 + $0x1f8] sm:$0xff]  ;;  %v4296_v11 = vand.u32 4294901760, %v3467_v33 }
  0xaf   :  { %2405 = vmatpush3.bf16.msra.mxu0 %v4427_v10  ;;  %630 = vmatprep.mubr.f32.mxu0 %v253_v16  ;;  %4440 = vst [vmem:[#allocation11_spill] sm:$0xff] %v3470_v1  ;;  %4441 = vst [vmem:[#allocation12_spill] sm:$0xff] %v3472_v5  ;;  %v3482_v10 = vld [vmem:[#allocation3 + $0x178] sm:$0xff]  ;;  %v4445_v16 = vpack.c.bf16 %v3066_v44, %v3061_v34  ;;  %v3499_v34 = vsub.f32 %v3465_v29, %v4299_v38  ;;  %v3547_v38 = vld [vmem:[#allocation3 + $0x110] sm:$0xff] }
  0xb0   :  { %2447 = vmatprep.subr.bf16.mxu1 %v4428_v57  ;;  %2407 = vmatprep.subr.bf16.mxu0 %v4429_v0  ;;  %4444 = vst [vmem:[#allocation14_spill] sm:$0xff] %v3482_v10  ;;  %v4297_v0 = vand.u32 4294901760, %v3470_v1  ;;  %v4303_v59 = vand.u32 4294901760, %v3482_v10  ;;  %v3504_v44 = vsub.f32 %v3467_v33, %v4296_v11 }
  0xb2   :  { %2449 = vmatpush3.bf16.msra.mxu1 %v4430_v36  ;;  %v3540_v11 = vsub.f32 %v3482_v10, %v4303_v59  ;;  %v4449_v59 = vpack.c.bf16 %v3184_v14, %v3180_v27  ;;  %v4451_v27 = vand.u32 4294901760, %v3499_v34  ;;  %v4452_v14 = vand.u32 4294901760, %v3504_v44 }
  0xb3   :  { %2409 = vmatpush3.bf16.msra.mxu0 %v4431_v63  ;;  %2451 = vmatprep.subr.bf16.mxu1 %v4432_v45  ;;  %v4298_v63 = vand.u32 4294901760, %v3472_v5  ;;  %v4455_v10 = vpack.c.bf16 %v3200_v53, %v3196_v51 }
  0xb4   :  { %2411 = vmatprep.subr.bf16.mxu0 %v4433_v15  ;;  %v4446_v15 = vpack.c.bf16 %v3087_v9, %v3073_v41  ;;  %v3511_v41 = vld [vmem:[#allocation3 + $0x188] sm:$0xff]  ;;  %v3513_v9 = vld [vmem:[#allocation3 + $0x100] sm:$0xff] }
  0xb5   :  { %v4460_v51 = vand.u32 4294901760, %v3511_v41 }
  0xb6   :  { %2453 = vmatpush3.bf16.msra.mxu1 %v4434_v20 }
  0xb7   :  { %2413 = vmatpush3.bf16.msra.mxu0 %v4435_v21  ;;  %2455 = vmatprep.subr.bf16.mxu1 %v4436_v22  ;;  %v4447_v21 = vpack.c.bf16 %v3117_v37, %v3099_v3  ;;  %v3527_v37 = vsub.f32 %v3472_v5, %v4298_v63  ;;  %v3530_v3 = vld [vmem:[#allocation3 + $0x198] sm:$0xff] }
  0xb8   :  { %2415 = vmatprep.subr.bf16.mxu0 %v4437_v28  ;;  %v3509_v28 = vld [vmem:[#allocation3 + $0x180] sm:$0xff] }
  0xb9   :  { %v4458_v63 = vand.u32 4294901760, %v3509_v28 }
  0xba   :  { %2457 = vmatpush3.bf16.msra.mxu1 %v3246_v55 }
  0xbb   :  { %2417 = vmatpush3.bf16.msra.mxu0 %v4442_v35  ;;  %2459 = vmatprep.subr.bf16.mxu1 %v3250_v43  ;;  %v3515_v35 = vld [vmem:[#allocation3 + $0x108] sm:$0xff] }
  0xbc   :  { %2419 = vmatprep.subr.bf16.mxu0 %v4445_v16  ;;  %v3517_v16 = vld [vmem:[#allocation3 + $0x190] sm:$0xff] }
  0xbe   :  { %2461 = vmatpush3.bf16.msra.mxu1 %v3255_v54 }
  0xbf   :  { %2421 = vmatpush3.bf16.msra.mxu0 %v4446_v15  ;;  %2463 = vmatprep.subr.bf16.mxu1 %v3257_v49  ;;  %v3522_v15 = vsub.f32 %v3470_v1, %v4297_v0  ;;  %v4448_v0 = vpack.c.bf16 %v3143_v56, %v3138_v30  ;;  %v4306_v30 = vand.u32 4294901760, %v3540_v11 }
  0xc0   :  { %2423 = vmatprep.subr.bf16.mxu0 %v4447_v21  ;;  %v3535_v21 = vsub.f32 %v3480_v46, %v4301_v18  ;;  %v4305_v46 = vand.u32 4294901760, %v3527_v37 }
  0xc1   :  { %v4308_v18 = vand.u32 4294901760, %v3522_v15 }
  0xc2   :  { %2465 = vmatpush3.bf16.msra.mxu1 %v3260_v7  ;;  %v4307_v56 = vand.u32 4294901760, %v3535_v21 }
  0xc3   :  { %2425 = vmatpush3.bf16.msra.mxu0 %v4448_v0  ;;  %2499 = vmatprep.subr.bf16.mxu1 %v2929_v62  ;;  %v4450_v0 = vand.u32 4294901760, %v3426_v13  ;;  %v4454_v62 = vmov 1.0  }
  0xc4   :  { %2427 = vmatprep.subr.bf16.mxu0 %v4449_v59  ;;  %v3569_v59 = vpack.c.bf16 %v4452_v14, %v4451_v27  ;;  %v3583_v27 = vld [vmem:[#allocation3 + $0x1a0] sm:$0xff]  ;;  %v4457_v14 = vpack.c.bf16 %v3219_v48, %v3217_v47  ;;  %v3608_v53 = vpack.c.bf16 %v4306_v30, %v4307_v56  ;;  %v4465_v48 = vand.u32 4294901760, %v3515_v35 }
  0xc5   :  { %741 = vmatmul.mubr.f32.vlgmr.msra.gmra.mrb[2].mxu1 %v4450_v0  ;;  %v3597_v0 = vsub.f32 %v3509_v28, %v4458_v63  ;;  %v4469_v30 = vand.u32 4294901760, %v3530_v3  ;;  %v4534_v32 = vand.u32 4294901760, %v3583_v27 }
  0xc6   :  { %4453 = vst [vmem:[#allocation15_spill] sm:$0xff] %v3569_v59  ;;  %2501 = vmatpush3.bf16.msra.mxu1 %v2952_v6  ;;  %1910 = vmatprep.mubr.msk.f32.mxu1 %vm3402_vm4, %v4454_v62  ;;  %v3589_v6 = vpack.c.bf16 %v4305_v46, %v4308_v18  ;;  %4462 = vst [vmem:[#allocation27_spill] sm:$0xff] %v3608_v53  ;;  %v3618_v63 = vsub.f32 %v3515_v35, %v4465_v48  ;;  %v3625_v46 = vld [vmem:[#allocation3 + $0x1a8] sm:$0xff]  ;;  %v4473_v48 = vand.u32 4294901760, %v3549_v23  ;;  %v3652_v59 = vld [vmem:[#allocation3 + $0x120] sm:$0xff] }
  0xc7   :  { %2429 = vmatpush3.bf16.msra.mxu0 %v4455_v10  ;;  %2503 = vmatprep.subr.bf16.mxu1 %v2980_v39  ;;  %4459 = vst [vmem:[#allocation25_spill] sm:$0xff] %v3597_v0  ;;  %v3602_v39 = vsub.f32 %v3511_v41, %v4460_v51  ;;  %v4463_v10 = vand.u32 4294901760, %v3513_v9  ;;  %v3631_v56 = vsub.f32 %v3530_v3, %v4469_v30  ;;  %v4310_v30 = vand.u32 4294901760, %v3597_v0 }
  0xc8   :  { %4456 = vst [vmem:[#allocation24_spill] sm:$0xff] %v3589_v6  ;;  %2431 = vmatprep.subr.bf16.mxu0 %v4457_v14  ;;  %4466 = vst [vmem:[#allocation29_spill] sm:$0xff] %v3618_v63  ;;  %v4467_v14 = vand.u32 4294901760, %v3517_v16  ;;  %v3641_v53 = vsub.f32 %v3549_v23, %v4473_v48  ;;  %v4312_v6 = vand.u32 4294901760, %v3625_v46 }
  0xc9   :  { %4461 = vst [vmem:[#allocation26_spill] sm:$0xff] %v3602_v39  ;;  %v3613_v47 = vsub.f32 %v3513_v9, %v4463_v10  ;;  %4470 = vst [vmem:[#allocation31_spill] sm:$0xff] %v3631_v56  ;;  %v4471_v10 = vand.u32 4294901760, %v3547_v38 }
  0xca   :  { %v3623_v51 = vsub.f32 %v3517_v16, %v4467_v14  ;;  %2505 = vmatpush3.bf16.msra.mxu1 %v3031_v12  ;;  %4474 = vst [vmem:[#allocation33_spill] sm:$0xff] %v3641_v53  ;;  %v4475_v12 = vpack.c.bf16 %v3232_v40, %v3230_v42  ;;  %v4314_v14 = vand.u32 4294901760, %v3618_v63  ;;  %v4315_v42 = vand.u32 4294901760, %v3631_v56 }
  0xcb   :  { %4464 = vst [vmem:[#allocation28_spill] sm:$0xff] %v3613_v47  ;;  %v3636_v18 = vsub.f32 %v3547_v38, %v4471_v10  ;;  %2507 = vmatprep.subr.bf16.mxu1 %v4425_v58  ;;  %v4311_v10 = vand.u32 4294901760, %v3602_v39  ;;  %v4313_v48 = vand.u32 4294901760, %v3613_v47  ;;  %v4476_v58 = vand.u32 4294901760, %v3583_v27 }
  0xcc   :  { %4468 = vst [vmem:[#allocation30_spill] sm:$0xff] %v3623_v51  ;;  %2433 = vmatpush3.bf16.msra.mxu0 %v4475_v12  ;;  %v4317_v5 = vand.u32 4294901760, %v3623_v51 }
  0xcd   :  { %4472 = vst [vmem:[#allocation32_spill] sm:$0xff] %v3636_v18  ;;  %2467 = vmatprep.subr.bf16.mxu0 %v3302_v4  ;;  %v4316_v40 = vand.u32 4294901760, %v3636_v18  ;;  %v4320_v4 = vand.u32 4294901760, %v3641_v53  ;;  %v3665_v12 = vsub.f32 %v3583_v27, %v4476_v58  ;;  %v1253_v58 = vsub.f32 %v3602_v39, %v4311_v10  ;;  %v3840_v39 = vld [vmem:[#allocation3 + $0x1e0] sm:$0xff] }
  0xce   :  { %2509 = vmatpush3.bf16.msra.mxu1 %v4426_v8  ;;  %v1246_v8 = vsub.f32 %v3597_v0, %v4310_v30  ;;  %v1260_v30 = vsub.f32 %v3623_v51, %v4317_v5  ;;  %v1267_v10 = vsub.f32 %v3631_v56, %v4315_v42  ;;  %v3719_v56 = vld [vmem:[#allocation3 + $0x1b8] sm:$0xff]  ;;  %v3842_v0 = vld [vmem:[#allocation3 + $0x1e8] sm:$0xff]  ;;  %v4539_v27 = vand.u32 4294901760, %v3504_v44 }
  0xcf   :  { %633 = vmatmul.mubr.f32.vlgmr.msra.gmra.mrb[2].mxu0 %v3426_v13  ;;  %4477 = vst [vmem:[#allocation34_spill] sm:$0xff] %v3665_v12  ;;  %v4325_v13 = vand.u32 4294901760, %v3652_v59  ;;  %2511 = vmatprep.subr.bf16.mxu1 %v4428_v57  ;;  %v1134_v57 = vsub.f32 %v3613_v47, %v4313_v48  ;;  %v1155_v48 = vsub.f32 %v3641_v53, %v4320_v4  ;;  %v1254_v5 = vand.u32 4294901760, %v1253_v58  ;;  %v3717_v4 = vld [vmem:[#allocation3 + $0x1b0] sm:$0xff] }
  0xd0   :  { %2469 = vmatpush3.bf16.msra.mxu0 %v3308_v50  ;;  %1908 = vmatprep.mubr.msk.f32.mxu0 %vm3402_vm4, %v4454_v62  ;;  %v3683_v50 = vsub.f32 %v3625_v46, %v4312_v6  ;;  %v1148_v6 = vsub.f32 %v3636_v18, %v4316_v40  ;;  %v1247_v40 = vand.u32 4294901760, %v1246_v8  ;;  %v4480_v8 = vand.u32 4294901760, %v3665_v12  ;;  %v3729_v18 = vld [vmem:[#allocation3 + $0x1c0] sm:$0xff] }
  0xd1   :  { %2471 = vmatprep.subr.bf16.mxu0 %v3314_v19  ;;  %v1141_v19 = vsub.f32 %v3618_v63, %v4314_v14  ;;  %v3713_v42 = vsub.f32 %v3652_v59, %v4325_v13  ;;  %v1135_v14 = vand.u32 4294901760, %v1134_v57  ;;  %v1268_v13 = vand.u32 4294901760, %v1267_v10  ;;  %v4502_v63 = vld [vmem:[#allocation18_spill] sm:$0xff] }
  0xd2   :  { %4478 = vst [vmem:[#allocation35_spill] sm:$0xff] %v3683_v50  ;;  %2513 = vmatpush3.bf16.msra.mxu1 %v4430_v36  ;;  %v3723_v36 = vld [vmem:[#allocation3 + $0x138] sm:$0xff]  ;;  %v1149_v51 = vand.u32 4294901760, %v1148_v6  ;;  %v1274_v58 = vsub.f32 %v3665_v12, %v4480_v8  ;;  %v4481_v57 = vand.u32 4294901760, %v3685_v24  ;;  %v4483_v6 = vand.u32 4294901760, %v3683_v50  ;;  %v3747_v8 = vld [vmem:[#allocation3 + $0x1c8] sm:$0xff] }
  0xd3   :  { %2515 = vmatprep.subr.bf16.mxu1 %v4432_v45  ;;  %4479 = vst [vmem:[#allocation36_spill] sm:$0xff] %v3713_v42  ;;  %v1142_v53 = vand.u32 4294901760, %v1141_v19  ;;  %v3721_v45 = vld [vmem:[#allocation3 + $0x130] sm:$0xff] }
  0xd4   :  { %2473 = vmatpush3.bf16.msra.mxu0 %v3320_v17  ;;  %v1261_v17 = vand.u32 4294901760, %v1260_v30  ;;  %v3737_v19 = vsub.f32 %v3685_v24, %v4481_v57  ;;  %v1281_v10 = vsub.f32 %v3683_v50, %v4483_v6  ;;  %v2562_v30 = vpack.c.bf16 %v1254_v5, %v1247_v40  ;;  %v3757_v50 = vld [vmem:[#allocation3 + $0x140] sm:$0xff]  ;;  %v3773_v40 = vld [vmem:[#allocation3 + $0x148] sm:$0xff] }
  0xd5   :  { %2475 = vmatprep.subr.bf16.mxu0 %v3326_v52  ;;  %v1156_v52 = vand.u32 4294901760, %v1155_v48  ;;  %v4332_v48 = vand.u32 4294901760, %v3719_v56  ;;  %v1275_v6 = vand.u32 4294901760, %v1274_v58 }
  0xd6   :  { %2517 = vmatpush3.bf16.msra.mxu1 %v4434_v20  ;;  %4482 = vst [vmem:[#allocation37_spill] sm:$0xff] %v3737_v19  ;;  %v3751_v20 = vpack.c.bf16 %v1142_v53, %v1135_v14  ;;  %v4485_v53 = vand.u32 4294901760, %v3717_v4 }
  0xd7   :  { %2519 = vmatprep.subr.bf16.mxu1 %v4436_v22  ;;  %v3755_v12 = vpack.c.bf16 %v1156_v52, %v1149_v51  ;;  %v4484_v22 = vand.u32 4294901760, %v3713_v42  ;;  %v3783_v52 = vsub.f32 %v3719_v56, %v4332_v48  ;;  %v4491_v51 = vand.u32 4294901760, %v3509_v28 }
  0xd8   :  { %2477 = vmatpush3.bf16.msra.mxu0 %v3332_v2  ;;  %v4333_v2 = vand.u32 4294901760, %v3721_v45  ;;  %v3770_v14 = vsub.f32 %v3717_v4, %v4485_v53  ;;  %v4494_v48 = vand.u32 4294901760, %v3515_v35  ;;  %v4497_v28 = vmov 0.0  }
  0xd9   :  { %2479 = vmatprep.subr.bf16.mxu0 %v3338_v60  ;;  %v3753_v60 = vpack.c.bf16 %v1268_v13, %v1261_v17  ;;  %v3764_v5 = vsub.f32 %v3713_v42, %v4484_v22  ;;  %v3775_v13 = vld [vmem:[#allocation3 + $0x1d0] sm:$0xff]  ;;  %v1282_v17 = vand.u32 4294901760, %v1281_v10  ;;  %v4489_v22 = vand.u32 4294901760, %v3723_v36 }
  0xda   :  { %2521 = vmatpush3.bf16.msra.mxu1 %v3246_v55  ;;  %v3788_v58 = vsub.f32 %v3721_v45, %v4333_v2  ;;  %v4493_v55 = vand.u32 4294901760, %v3513_v9  ;;  %v4495_v2 = vand.u32 4294901760, %v3729_v18  ;;  %v4500_v9 = vand.u32 4294901760, %v3747_v8 }
  0xdb   :  { %2523 = vmatprep.subr.bf16.mxu1 %v3250_v43  ;;  %v4486_v43 = vld [vmem:[#allocation16_spill] sm:$0xff]  ;;  %v3793_v53 = vsub.f32 %v3723_v36, %v4489_v22  ;;  %v2570_v47 = vpack.c.bf16 %v1282_v17, %v1275_v6  ;;  %v4504_v17 = vand.u32 4294901760, %v3773_v40  ;;  %v4511_v29 = vand.u32 4294901760, %v3783_v52 }
  0xdc   :  { %2481 = vmatpush3.bf16.msra.mxu0 %v3344_v61  ;;  %v3777_v61 = vld [vmem:[#allocation3 + $0x1d8] sm:$0xff]  ;;  %4487 = vst [vmem:[#allocation16_spill] sm:$0xff] %v3783_v52  ;;  %4488 = vst [vmem:[#allocation38_spill] sm:$0xff] %v3788_v58  ;;  %v3805_v57 = vpack.c.bf16 %v4494_v48, %v4493_v55  ;;  %v3810_v42 = vsub.f32 %v3729_v18, %v4495_v2  ;;  %v3820_v48 = vld [vmem:[#allocation3 + $0x150] sm:$0xff]  ;;  %v3834_v35 = vsub.f32 %v3747_v8, %v4500_v9 }
  0xdd   :  { %2483 = vmatprep.subr.bf16.mxu0 %v4486_v43  ;;  %4490 = vst [vmem:[#allocation39_spill] sm:$0xff] %v3793_v53  ;;  %v4492_v43 = vand.u32 4294901760, %v3511_v41  ;;  %v1905_v41 = vsel %vm3430_vm6, 1.0, %v4497_v28  ;;  %v3822_v55 = vld [vmem:[#allocation3 + $0x158] sm:$0xff]  ;;  %v4498_v2 = vld [vmem:[#allocation17_spill] sm:$0xff]  ;;  %v4507_v9 = vand.u32 4294901760, %v3777_v61 }
  0xde   :  { %4496 = vst [vmem:[#allocation40_spill] sm:$0xff] %v3810_v42  ;;  %2525 = vmatpush3.bf16.msra.mxu1 %v3255_v54  ;;  %v1163_v54 = vand.u32 4294901760, %v3764_v5  ;;  %4501 = vst [vmem:[#allocation17_spill] sm:$0xff] %v3834_v35  ;;  %v3858_v5 = vsub.f32 %v3773_v40, %v4504_v17  ;;  %v4513_v28 = vand.u32 4294901760, %v3793_v53 }
  0xdf   :  { %v3799_v10 = vpack.c.bf16 %v4492_v43, %v4491_v51  ;;  %2527 = vmatprep.subr.bf16.mxu1 %v3257_v49  ;;  %v4499_v43 = vand.u32 4294901760, %v3737_v19 }
  0xe0   :  { %2485 = vmatpush3.bf16.msra.mxu0 %v4498_v2 }
  0xe1   :  { %v1169_v22 = vsub.f32 %v3737_v19, %v4499_v43  ;;  %2487 = vmatprep.subr.bf16.mxu0 %v4502_v63  ;;  %v3844_v43 = vsub.f32 %v1905_v41, %v1905_v41  ;;  %v4503_v63 = vand.u32 4294901760, %v3757_v50  ;;  %v4505_v41 = vand.u32 4294901760, %v3775_v13 }
  0xe2   :  { %2529 = vmatpush3.bf16.msra.mxu1 %v3260_v7  ;;  %v3868_v19 = vsub.f32 %v3777_v61, %v4507_v9  ;;  %v4508_v7 = vld [vmem:[#allocation19_spill] sm:$0xff]  ;;  %v1295_v9 = vsub.f32 %v3783_v52, %v4511_v29  ;;  %v4515_v29 = vand.u32 4294901760, %v3820_v48 }
  0xe3   :  { %v3853_v6 = vsub.f32 %v3757_v50, %v4503_v63  ;;  %v3863_v51 = vsub.f32 %v3775_v13, %v4505_v41  ;;  %2563 = vmatprep.subr.bf16.mxu1 %v2562_v30  ;;  %v4509_v63 = vand.u32 4294901760, %v3770_v14  ;;  %v4510_v41 = vld [vmem:[#allocation20_spill] sm:$0xff]  ;;  %v1170_v33 = vand.u32 4294901760, %v1169_v22 }
  0xe4   :  { %2489 = vmatpush3.bf16.msra.mxu0 %v4508_v7  ;;  %v4512_v7 = vand.u32 4294901760, %v3788_v58  ;;  %v4514_v22 = vand.u32 4294901760, %v3810_v42  ;;  %v3897_v2 = vsub.f32 %v3820_v48, %v4515_v29  ;;  %v1296_v1 = vand.u32 4294901760, %v1295_v9 }
  0xe5   :  { %4506 = vst [vmem:[#allocation18_spill] sm:$0xff] %v3863_v51  ;;  %v1288_v49 = vsub.f32 %v3770_v14, %v4509_v63  ;;  %2491 = vmatprep.subr.bf16.mxu0 %v4510_v41  ;;  %v1183_v63 = vsub.f32 %v3793_v53, %v4513_v28  ;;  %1911 = vmatmul.mubr.msk.f32.vlgmr.msra.gmra.mrb[4].mxu1 %vm3414_vm8, %v4454_v62  ;;  %v4519_v28 = vand.u32 4294901760, %v3842_v0  ;;  %v4520_v53 = vand.u32 4294901760, %v3844_v43 }
  0xe6   :  { %v1176_v30 = vsub.f32 %v3788_v58, %v4512_v7  ;;  %v1302_v41 = vsub.f32 %v3810_v42, %v4514_v22  ;;  %v4516_v7 = vand.u32 4294901760, %v3822_v55  ;;  %2565 = vmatpush3.bf16.msra.mxu1 %v3751_v20  ;;  %1912 = vmatprep.mubr.msk.f32.mxu1 %vm3430_vm6, %v4454_v62  ;;  %v4518_v42 = vand.u32 4294901760, %v3840_v39 }
  0xe7   :  { %2567 = vmatprep.subr.bf16.mxu1 %v3753_v60  ;;  %v3925_v22 = vsub.f32 %v3842_v0, %v4519_v28  ;;  %v2572_v29 = vpack.c.bf16 %v1170_v33, %v1163_v54  ;;  %v4521_v28 = vand.u32 4294901760, %v3853_v6  ;;  %v4523_v54 = vand.u32 4294901760, %v3863_v51 }
  0xe8   :  { %v3902_v17 = vsub.f32 %v3822_v55, %v4516_v7  ;;  %2493 = vmatpush3.bf16.msra.mxu0 %v3380_v31  ;;  %v4517_v7 = vand.u32 4294901760, %v3834_v35  ;;  %v3920_v25 = vsub.f32 %v3840_v39, %v4518_v42  ;;  %v1289_v31 = vand.u32 4294901760, %v1288_v49 }
  0xe9   :  { %2495 = vmatprep.subr.bf16.mxu0 %v3386_v26  ;;  %v1177_v60 = vand.u32 4294901760, %v1176_v30  ;;  %v1190_v52 = vsub.f32 %v3853_v6, %v4521_v28  ;;  %v4522_v26 = vand.u32 4294901760, %v3858_v5  ;;  %v1316_v49 = vsub.f32 %v3863_v51, %v4523_v54  ;;  %v4525_v30 = vld [vmem:[#allocation21_spill] sm:$0xff] }
  0xea   :  { %v1309_v20 = vsub.f32 %v3834_v35, %v4517_v7  ;;  %v1117_v7 = vsub.f32 %v3844_v43, %v4520_v53  ;;  %v1184_v35 = vand.u32 4294901760, %v1183_v63  ;;  %2569 = vmatpush3.bf16.msra.mxu1 %v3755_v12  ;;  %v4524_v53 = vand.u32 4294901760, %v3868_v19 }
  0xeb   :  { %v1197_v33 = vsub.f32 %v3858_v5, %v4522_v26  ;;  %2571 = vmatprep.subr.bf16.mxu1 %v2570_v47  ;;  %v1303_v12 = vand.u32 4294901760, %v1302_v41  ;;  %v2574_v26 = vpack.c.bf16 %v1296_v1, %v1289_v31  ;;  %v4526_v58 = vand.u32 4294901760, %v3517_v16 }
  0xec   :  { %v1323_v9 = vsub.f32 %v3868_v19, %v4524_v53  ;;  %2497 = vmatpush3.bf16.msra.mxu0 %v4525_v30  ;;  %v1310_v63 = vand.u32 4294901760, %v1309_v20  ;;  %v4527_v54 = vand.u32 4294901760, %v3530_v3  ;;  %v4528_v53 = vand.u32 4294901760, %v3547_v38 }
  0xed   :  { %2531 = vmatprep.subr.bf16.mxu0 %v3799_v10  ;;  %v4529_v30 = vand.u32 4294901760, %v3549_v23  ;;  %v1118_v41 = vand.u32 4294901760, %v1117_v7  ;;  %v2576_v20 = vpack.c.bf16 %v1184_v35, %v1177_v60  ;;  %v4530_v42 = vand.u32 4294901760, %v3897_v2 }
  0xee   :  { %v3954_v51 = vpack.c.bf16 %v4527_v54, %v4526_v58  ;;  %v4531_v1 = vand.u32 4294901760, %v3902_v17  ;;  %2573 = vmatpush3.bf16.msra.mxu1 %v2572_v29  ;;  %v1191_v38 = vand.u32 4294901760, %v1190_v52  ;;  %v1198_v3 = vand.u32 4294901760, %v1197_v33 }
  0xef   :  { %v3960_v47 = vpack.c.bf16 %v4529_v30, %v4528_v53  ;;  %v1204_v28 = vsub.f32 %v3897_v2, %v4530_v42  ;;  %1909 = vmatmul.mubr.msk.f32.vlgmr.msra.gmra.mrb[4].mxu0 %vm3414_vm8, %v4454_v62  ;;  %v1317_v23 = vand.u32 4294901760, %v1316_v49  ;;  %v1324_v58 = vand.u32 4294901760, %v1323_v9  ;;  %2575 = vmatprep.subr.bf16.mxu1 %v2574_v26 }
  0xf0   :  { %v1211_v16 = vsub.f32 %v3902_v17, %v4531_v1  ;;  %2533 = vmatpush3.bf16.msra.mxu0 %v3805_v57  ;;  %1119 = vmatprep.mubr.f32.mxu0 %v1118_v41  ;;  %v2578_v35 = vpack.c.bf16 %v1310_v63, %v1303_v12  ;;  %v4532_v31 = vand.u32 4294901760, %v3920_v25  ;;  %v4533_v7 = vand.u32 4294901760, %v3925_v22 }
  0xf1   :  { %2535 = vmatprep.subr.bf16.mxu0 %v3954_v51  ;;  %v4535_v52 = vand.u32 4294901760, %v3625_v46  ;;  %v4536_v33 = vand.u32 4294901760, %v3652_v59  ;;  %v4537_v49 = vand.u32 4294901760, %v3685_v24  ;;  %v1205_v12 = vand.u32 4294901760, %v1204_v28 }
  0xf2   :  { %v1330_v60 = vsub.f32 %v3920_v25, %v4532_v31  ;;  %v1337_v42 = vsub.f32 %v3925_v22, %v4533_v7  ;;  %v1212_v63 = vand.u32 4294901760, %v1211_v16  ;;  %2577 = vmatpush3.bf16.msra.mxu1 %v2576_v20  ;;  %v2580_v54 = vpack.c.bf16 %v1198_v3, %v1191_v38 }
  0xf3   :  { %v3983_v29 = vpack.c.bf16 %v4535_v52, %v4534_v32  ;;  %v3989_v9 = vpack.c.bf16 %v4537_v49, %v4536_v33  ;;  %v2582_v53 = vpack.c.bf16 %v1324_v58, %v1317_v23  ;;  %v4538_v26 = vand.u32 4294901760, %v3499_v34  ;;  %2579 = vmatprep.subr.bf16.mxu1 %v2578_v35 }
  0xf4   :  { %v1225_v46 = vsub.f32 %v3504_v44, %v4539_v27  ;;  %2537 = vmatpush3.bf16.msra.mxu0 %v3960_v47  ;;  %v1331_v59 = vand.u32 4294901760, %v1330_v60  ;;  %v1338_v24 = vand.u32 4294901760, %v1337_v42  ;;  %v4540_v41 = vand.u32 4294901760, %v3522_v15 }
  0xf5   :  { %v1218_v30 = vsub.f32 %v3499_v34, %v4538_v26  ;;  %v4541_v20 = vand.u32 4294901760, %v3527_v37  ;;  %2539 = vmatprep.subr.bf16.mxu0 %v3983_v29  ;;  %v4542_v16 = vand.u32 4294901760, %v3717_v4  ;;  %v4543_v38 = vand.u32 4294901760, %v3719_v56 }
  0xf6   :  { %v1344_v28 = vsub.f32 %v3522_v15, %v4540_v41  ;;  %v2584_v23 = vpack.c.bf16 %v1212_v63, %v1205_v12  ;;  %2581 = vmatpush3.bf16.msra.mxu1 %v2580_v54  ;;  %v1226_v35 = vand.u32 4294901760, %v1225_v46  ;;  %v4544_v31 = vand.u32 4294901760, %v3535_v21 }
  0xf7   :  { %v1351_v1 = vsub.f32 %v3527_v37, %v4541_v20  ;;  %v4009_v3 = vpack.c.bf16 %v4543_v38, %v4542_v16  ;;  %v1219_v58 = vand.u32 4294901760, %v1218_v30  ;;  %v4545_v7 = vand.u32 4294901760, %v3540_v11  ;;  %2583 = vmatprep.subr.bf16.mxu1 %v2582_v53 }
  0xf8   :  { %v1232_v60 = vsub.f32 %v3535_v21, %v4544_v31  ;;  %2541 = vmatpush3.bf16.msra.mxu0 %v3989_v9  ;;  %v4546_v4 = vand.u32 4294901760, %v3721_v45  ;;  %v4547_v56 = vand.u32 4294901760, %v3723_v36  ;;  %v2586_v52 = vpack.c.bf16 %v1338_v24, %v1331_v59  ;;  %v4564_v31 = vld [vmem:[#allocation11_spill] sm:$0xff] }
  0xf9   :  { %v1239_v42 = vsub.f32 %v3540_v11, %v4545_v7  ;;  %v1345_v33 = vand.u32 4294901760, %v1344_v28  ;;  %v1352_v49 = vand.u32 4294901760, %v1351_v1  ;;  %2543 = vmatprep.subr.bf16.mxu0 %v4009_v3  ;;  %v4548_v12 = vand.u32 4294901760, %v3729_v18 }
  0xfa   :  { %v4022_v32 = vpack.c.bf16 %v4547_v56, %v4546_v4  ;;  %v4549_v63 = vand.u32 4294901760, %v3747_v8  ;;  %2585 = vmatpush3.bf16.msra.mxu1 %v2584_v23  ;;  %v2588_v26 = vpack.c.bf16 %v1226_v35, %v1219_v58  ;;  %v1233_v53 = vand.u32 4294901760, %v1232_v60  ;;  %v4569_v56 = vld [vmem:[#allocation13_spill] sm:$0xff] }
  0xfb   :  { %v1240_v30 = vand.u32 4294901760, %v1239_v42  ;;  %2587 = vmatprep.subr.bf16.mxu1 %v2586_v52  ;;  %v4550_v36 = vand.u32 4294901760, %v3757_v50  ;;  %v4551_v45 = vand.u32 4294901760, %v3773_v40  ;;  %v2590_v46 = vpack.c.bf16 %v1352_v49, %v1345_v33  ;;  %v4571_v33 = vld [vmem:[#allocation14_spill] sm:$0xff] }
  0xfc   :  { %v4029_v54 = vpack.c.bf16 %v4549_v63, %v4548_v12  ;;  %2545 = vmatpush3.bf16.msra.mxu0 %v4022_v32  ;;  %v4552_v18 = vand.u32 4294901760, %v3775_v13  ;;  %v4553_v8 = vand.u32 4294901760, %v3777_v61  ;;  %v4554_v24 = vmov 0.0  }
  0xfd   :  { %v4036_v27 = vpack.c.bf16 %v4551_v45, %v4550_v36  ;;  %v1904_v28 = vsel %vm3398_vm0, 1.0, %v4554_v24  ;;  %v2592_v20 = vpack.c.bf16 %v1240_v30, %v1233_v53  ;;  %v4556_v50 = vand.u32 4294901760, %v3820_v48  ;;  %v4560_v48 = vld [vmem:[#allocation9_spill] sm:$0xff]  ;;  %v4574_v53 = vld [vmem:[#allocation26_spill] sm:$0xff]  ;;  %v4575_v36 = vld [vmem:[#allocation28_spill] sm:$0xff] }
  0xfe   :  { %2547 = vmatprep.subr.bf16.mxu0 %v4029_v54  ;;  %v4043_v59 = vpack.c.bf16 %v4553_v8, %v4552_v18  ;;  %2589 = vmatpush3.bf16.msra.mxu1 %v2588_v26  ;;  %v4557_v40 = vand.u32 4294901760, %v3822_v55  ;;  %v4055_v13 = vsub.f32 %v1904_v28, %v1904_v28  ;;  %v4558_v61 = vand.u32 4294901760, %v3840_v39  ;;  %v4562_v55 = vld [vmem:[#allocation10_spill] sm:$0xff]  ;;  %v4566_v39 = vld [vmem:[#allocation12_spill] sm:$0xff]  ;;  %v4573_v26 = vld [vmem:[#allocation25_spill] sm:$0xff] }
  0xff   :  { %2591 = vmatprep.subr.bf16.mxu1 %v2590_v46  ;;  %v4559_v16 = vand.u32 4294901760, %v3842_v0  ;;  %v4561_v23 = vand.u32 4294901760, %v4560_v48  ;;  %v4563_v58 = vand.u32 4294901760, %v4562_v55  ;;  %v4565_v60 = vand.u32 4294901760, %v4564_v31  ;;  %v4576_v45 = vld [vmem:[#allocation29_spill] sm:$0xff]  ;;  %v4577_v8 = vld [vmem:[#allocation30_spill] sm:$0xff] }
 0x100   :  { %2549 = vmatpush3.bf16.msra.mxu0 %v4036_v27  ;;  %v4053_v1 = vpack.c.bf16 %v4557_v40, %v4556_v50  ;;  %v4567_v7 = vand.u32 4294901760, %v4566_v39  ;;  %v1122_v42 = vand.u32 4294901760, %v4055_v13  ;;  %v4568_v4 = vand.u32 4294901760, %v3844_v43  ;;  %v4578_v24 = vld [vmem:[#allocation31_spill] sm:$0xff]  ;;  %v4580_v50 = vld [vmem:[#allocation33_spill] sm:$0xff] }
 0x101   :  { %2551 = vmatprep.subr.bf16.mxu0 %v4043_v59  ;;  %v4062_v38 = vpack.c.bf16 %v4559_v16, %v4558_v61  ;;  %v4070_v35 = vpack.c.bf16 %v4563_v58, %v4561_v23  ;;  %v4570_v52 = vand.u32 4294901760, %v4569_v56  ;;  %v4572_v49 = vand.u32 4294901760, %v4571_v33  ;;  %v4581_v61 = vld [vmem:[#allocation34_spill] sm:$0xff]  ;;  %v4582_v16 = vld [vmem:[#allocation35_spill] sm:$0xff]  ;;  %v4583_v23 = vld [vmem:[#allocation36_spill] sm:$0xff] }
 0x102   :  { %2593 = vmatpush3.bf16.msra.mxu1 %v2592_v20  ;;  %v4077_v0 = vpack.c.bf16 %v4567_v7, %v4565_v60  ;;  %v1123_v63 = vsub.f32 %v4055_v13, %v1122_v42  ;;  %v2594_v30 = vpack.c.bf16 %v4574_v53, %v4573_v26  ;;  %v2596_v46 = vpack.c.bf16 %v4576_v45, %v4575_v36  ;;  %v4579_v20 = vld [vmem:[#allocation32_spill] sm:$0xff]  ;;  %v4584_v55 = vld [vmem:[#allocation37_spill] sm:$0xff]  ;;  %v4586_v60 = vld [vmem:[#allocation38_spill] sm:$0xff] }
 0x103   :  { %2627 = vmatprep.subr.bf16.mxu1 %v3799_v10  ;;  %v4092_v12 = vpack.c.bf16 %v4572_v49, %v4570_v52  ;;  %v2598_v28 = vpack.c.bf16 %v4578_v24, %v4577_v8  ;;  %v2600_v40 = vpack.c.bf16 %v4580_v50, %v4579_v20  ;;  %v2602_v48 = vpack.c.bf16 %v4582_v16, %v4581_v61  ;;  %v4587_v39 = vld [vmem:[#allocation39_spill] sm:$0xff]  ;;  %v4589_v56 = vld [vmem:[#allocation17_spill] sm:$0xff]  ;;  %v4590_v49 = vld [vmem:[#allocation18_spill] sm:$0xff] }
 0x104   :  { %2553 = vmatpush3.bf16.msra.mxu0 %v4053_v1  ;;  %v1124_v18 = vand.u32 4294901760, %v1123_v63  ;;  %v2604_v58 = vpack.c.bf16 %v4584_v55, %v4583_v23  ;;  %v2608_v7 = vpack.c.bf16 %v4587_v39, %v4586_v60  ;;  %v2612_v33 = vpack.c.bf16 %v3858_v5, %v3853_v6 }
 0x105   :  { %2555 = vmatprep.subr.bf16.mxu0 %v4062_v38  ;;  %1913 = vmatmul.mubr.msk.f32.vlgmr.msra.gmra.mrb[6].mxu1 %vm3398_vm0, %v4454_v62  ;;  %v2614_v63 = vpack.c.bf16 %v3868_v19, %v4590_v49 }
 0x106   :  { %2629 = vmatpush3.bf16.msra.mxu1 %v3805_v57  ;;  %1599 = vmatprep.mubr.f32.mxu1 %v4568_v4  ;;  %v4588_v4 = vld [vmem:[#allocation40_spill] sm:$0xff] }
 0x107   :  { %2631 = vmatprep.subr.bf16.mxu1 %v3954_v51  ;;  %v2610_v52 = vpack.c.bf16 %v4589_v56, %v4588_v4 }
 0x108   :  { %2557 = vmatpush3.bf16.msra.mxu0 %v4070_v35 }
 0x109   :  { %2559 = vmatprep.subr.bf16.mxu0 %v4077_v0 }
 0x10a   :  { %2633 = vmatpush3.bf16.msra.mxu1 %v3960_v47 }
 0x10b   :  { %2635 = vmatprep.subr.bf16.mxu1 %v3983_v29 }
 0x10c   :  { %2561 = vmatpush3.bf16.msra.mxu0 %v4092_v12 }
 0x10d   :  { %2595 = vmatprep.subr.bf16.mxu0 %v2594_v30  ;;  %v2616_v30 = vpack.c.bf16 %v3902_v17, %v3897_v2 }
 0x10e   :  { %2637 = vmatpush3.bf16.msra.mxu1 %v3989_v9 }
 0x10f   :  { %1125 = vmatmul.mubr.f32.vlgmr.msra.gmra.mrb[6].mxu0 %v1124_v18  ;;  %2639 = vmatprep.subr.bf16.mxu1 %v4009_v3  ;;  %v2620_v18 = vpack.c.bf16 %v3504_v44, %v3499_v34  ;;  %v4592_v34 = vand.u32 4294901760, %v4573_v26  ;;  %v4593_v44 = vand.u32 4294901760, %v4574_v53  ;;  %v4600_v26 = vand.u32 4294901760, %v4581_v61 }
 0x110   :  { %2597 = vmatpush3.bf16.msra.mxu0 %v2596_v46  ;;  %1492 = vmatprep.mubr.f32.mxu0 %v3844_v43  ;;  %v4585_v43 = vld [vmem:[#allocation16_spill] sm:$0xff]  ;;  %v2618_v46 = vpack.c.bf16 %v3925_v22, %v3920_v25  ;;  %v4601_v53 = vand.u32 4294901760, %v4582_v16  ;;  %v4609_v61 = vand.u32 4294901760, %v4589_v56 }
 0x111   :  { %2599 = vmatprep.subr.bf16.mxu0 %v2598_v28  ;;  %v2606_v31 = vpack.c.bf16 %v4585_v43, %v3770_v14  ;;  %v2622_v28 = vpack.c.bf16 %v3527_v37, %v3522_v15  ;;  %v4594_v15 = vand.u32 4294901760, %v4575_v36  ;;  %v4595_v37 = vand.u32 4294901760, %v4576_v45 }
 0x112   :  { %2641 = vmatpush3.bf16.msra.mxu1 %v4022_v32  ;;  %v4603_v36 = vand.u32 4294901760, %v4584_v55  ;;  %v4613_v55 = vand.u32 4294901760, %v3868_v19  ;;  %v4618_v19 = vld [vmem:[#allocation15_spill] sm:$0xff] }
 0x113   :  { %2643 = vmatprep.subr.bf16.mxu1 %v4029_v54 }
 0x114   :  { %2601 = vmatpush3.bf16.msra.mxu0 %v2600_v40 }
 0x115   :  { %2603 = vmatprep.subr.bf16.mxu0 %v2602_v48  ;;  %v2658_v48 = vpack.c.bf16 %v4593_v44, %v4592_v34 }
 0x116   :  { %2645 = vmatpush3.bf16.msra.mxu1 %v4036_v27 }
 0x117   :  { %2647 = vmatprep.subr.bf16.mxu1 %v4043_v59 }
 0x118   :  { %2605 = vmatpush3.bf16.msra.mxu0 %v2604_v58 }
 0x119   :  { %2607 = vmatprep.subr.bf16.mxu0 %v2606_v31 }
 0x11a   :  { %2649 = vmatpush3.bf16.msra.mxu1 %v4053_v1 }
 0x11b   :  { %2651 = vmatprep.subr.bf16.mxu1 %v4062_v38 }
 0x11c   :  { %2609 = vmatpush3.bf16.msra.mxu0 %v2608_v7 }
 0x11d   :  { %2611 = vmatprep.subr.bf16.mxu0 %v2610_v52 }
 0x11e   :  { %2653 = vmatpush3.bf16.msra.mxu1 %v4070_v35 }
 0x11f   :  { %2655 = vmatprep.subr.bf16.mxu1 %v4077_v0 }
 0x120   :  { %2613 = vmatpush3.bf16.msra.mxu0 %v2612_v33 }
 0x121   :  { %2615 = vmatprep.subr.bf16.mxu0 %v2614_v63 }
 0x122   :  { %2657 = vmatpush3.bf16.msra.mxu1 %v4092_v12 }
 0x123   :  { %2691 = vmatprep.subr.bf16.mxu1 %v3799_v10  ;;  %v2624_v10 = vpack.c.bf16 %v3540_v11, %v3535_v21  ;;  %v4597_v11 = vand.u32 4294901760, %v4578_v24 }
 0x124   :  { %2617 = vmatpush3.bf16.msra.mxu0 %v2616_v30 }
 0x125   :  { %2619 = vmatprep.subr.bf16.mxu0 %v2618_v46  ;;  %1603 = vmatmul.mubr.f32.vlgmr.msra.gmra.mrb[8].mxu1 %v1122_v42 }
 0x126   :  { %2693 = vmatpush3.bf16.msra.mxu1 %v3805_v57  ;;  %1916 = vmatprep.mubr.msk.f32.mxu1 %vm3430_vm6, %v4454_v62  ;;  %v2660_v57 = vpack.c.bf16 %v4595_v37, %v4594_v15 }
 0x127   :  { %2695 = vmatprep.subr.bf16.mxu1 %v3954_v51  ;;  %v4596_v51 = vand.u32 4294901760, %v4577_v8  ;;  %v4604_v8 = vand.u32 4294901760, %v3770_v14  ;;  %v4610_v14 = vand.u32 4294901760, %v3853_v6  ;;  %v4617_v6 = vand.u32 4294901760, %v3925_v22 }
 0x128   :  { %2621 = vmatpush3.bf16.msra.mxu0 %v2620_v18 }
 0x129   :  { %2623 = vmatprep.subr.bf16.mxu0 %v2622_v28  ;;  %v2662_v21 = vpack.c.bf16 %v4597_v11, %v4596_v51 }
 0x12a   :  { %2697 = vmatpush3.bf16.msra.mxu1 %v3960_v47  ;;  %v4598_v47 = vand.u32 4294901760, %v4579_v20 }
 0x12b   :  { %2699 = vmatprep.subr.bf16.mxu1 %v3983_v29  ;;  %v4599_v29 = vand.u32 4294901760, %v4580_v50  ;;  %v4608_v50 = vand.u32 4294901760, %v4588_v4 }
 0x12c   :  { %2625 = vmatpush3.bf16.msra.mxu0 %v2624_v10 }
 0x12d   :  { %2659 = vmatprep.subr.bf16.mxu0 %v2658_v48  ;;  %v2664_v42 = vpack.c.bf16 %v4599_v29, %v4598_v47  ;;  %v2674_v16 = vpack.c.bf16 %v4609_v61, %v4608_v50 }
 0x12e   :  { %2701 = vmatpush3.bf16.msra.mxu1 %v3989_v9  ;;  %v4602_v9 = vand.u32 4294901760, %v4583_v23  ;;  %v4612_v23 = vand.u32 4294901760, %v4590_v49 }
 0x12f   :  { %1495 = vmatmul.mubr.f32.vlgmr.msra.gmra.mrb[8].mxu0 %v4055_v13  ;;  %2703 = vmatprep.subr.bf16.mxu1 %v4009_v3  ;;  %v2666_v13 = vpack.c.bf16 %v4601_v53, %v4600_v26  ;;  %v4605_v3 = vand.u32 4294901760, %v4585_v43 }
 0x130   :  { %2661 = vmatpush3.bf16.msra.mxu0 %v2660_v57  ;;  %1914 = vmatprep.mubr.msk.f32.mxu0 %vm3430_vm6, %v4454_v62  ;;  %v2668_v45 = vpack.c.bf16 %v4603_v36, %v4602_v9  ;;  %v2678_v58 = vpack.c.bf16 %v4613_v55, %v4612_v23 }
 0x131   :  { %2663 = vmatprep.subr.bf16.mxu0 %v2662_v21  ;;  %v2670_v24 = vpack.c.bf16 %v4605_v3, %v4604_v8 }
 0x132   :  { %2705 = vmatpush3.bf16.msra.mxu1 %v4022_v32  ;;  %v4606_v32 = vand.u32 4294901760, %v4586_v60 }
 0x133   :  { %2707 = vmatprep.subr.bf16.mxu1 %v4029_v54  ;;  %v4607_v54 = vand.u32 4294901760, %v4587_v39 }
 0x134   :  { %2665 = vmatpush3.bf16.msra.mxu0 %v2664_v42 }
 0x135   :  { %2667 = vmatprep.subr.bf16.mxu0 %v2666_v13  ;;  %v2672_v20 = vpack.c.bf16 %v4607_v54, %v4606_v32 }
 0x136   :  { %2709 = vmatpush3.bf16.msra.mxu1 %v4036_v27  ;;  %v4611_v27 = vand.u32 4294901760, %v3858_v5  ;;  %v4616_v5 = vand.u32 4294901760, %v3920_v25 }
 0x137   :  { %2711 = vmatprep.subr.bf16.mxu1 %v4043_v59 }
 0x138   :  { %2669 = vmatpush3.bf16.msra.mxu0 %v2668_v45  ;;  %v2676_v59 = vpack.c.bf16 %v4611_v27, %v4610_v14  ;;  %v2682_v31 = vpack.c.bf16 %v4617_v6, %v4616_v5 }
 0x139   :  { %2671 = vmatprep.subr.bf16.mxu0 %v2670_v24 }
 0x13a   :  { %2713 = vmatpush3.bf16.msra.mxu1 %v4053_v1  ;;  %v4614_v1 = vand.u32 4294901760, %v3897_v2  ;;  %v4619_v2 = vld [vmem:[#allocation24_spill] sm:$0xff] }
 0x13b   :  { %2715 = vmatprep.subr.bf16.mxu1 %v4062_v38  ;;  %v4615_v38 = vand.u32 4294901760, %v3902_v17  ;;  %v4620_v17 = vld [vmem:[#allocation27_spill] sm:$0xff] }
 0x13c   :  { %2673 = vmatpush3.bf16.msra.mxu0 %v2672_v20 }
 0x13d   :  { %2675 = vmatprep.subr.bf16.mxu0 %v2674_v16  ;;  %v2680_v43 = vpack.c.bf16 %v4615_v38, %v4614_v1 }
 0x13e   :  { %2717 = vmatpush3.bf16.msra.mxu1 %v4070_v35 }
 0x13f   :  { %2719 = vmatprep.subr.bf16.mxu1 %v4077_v0 }
 0x140   :  { %2677 = vmatpush3.bf16.msra.mxu0 %v2676_v59 }
 0x141   :  { %2679 = vmatprep.subr.bf16.mxu0 %v2678_v58 }
 0x142   :  { %2721 = vmatpush3.bf16.msra.mxu1 %v4092_v12 }
 0x144   :  { %2681 = vmatpush3.bf16.msra.mxu0 %v2680_v43 }
 0x145   :  { %2683 = vmatprep.subr.bf16.mxu0 %v2682_v31  ;;  %1917 = vmatmul.mubr.msk.f32.vlgmr.msra.gmra.mrb[10].mxu1 %vm3398_vm0, %v4454_v62 }
 0x148   :  { %2685 = vmatpush3.bf16.msra.mxu0 %v4618_v19 }
 0x149   :  { %2687 = vmatprep.subr.bf16.mxu0 %v4619_v2 }
 0x14c   :  { %2689 = vmatpush3.bf16.msra.mxu0 %v4620_v17 }
 0x14f   :  { %1915 = vmatmul.mubr.msk.f32.vlgmr.msra.gmra.mrb[10].mxu0 %vm3398_vm0, %v4454_v62 }
 0x178   :  { %v1985_v25 = vpop.f32.mrb[0].mxu1 }
 0x179   :  { %v1986_v22 = vpop.f32.mrb[1].mxu1 }
 0x17a   :  { %v1987_v35 = vadd.f32 %v1986_v22, %v1985_v25 }
 0x181   :  { %v1950_v0 = vpop.f32.mrb[0].mxu0 }
 0x182   :  { %v1951_v12 = vpop.f32.mrb[1].mxu0 }
 0x183   :  { %v1952_v60 = vadd.f32 %v1951_v12, %v1950_v0 }
 0x185   :  { %v497_v39 = vadd.f32 %v1987_v35, %v1952_v60 }
 0x198   :  { %v2055_v7 = vpop.f32.mrb[2].mxu1 }
 0x199   :  { %v2056_v4 = vpop.f32.mrb[3].mxu1 }
 0x19a   :  { %v2057_v56 = vadd.f32 %v2056_v4, %v2055_v7 }
 0x1a2   :  { %v2020_v52 = vpop.f32.mrb[2].mxu0 }
 0x1a3   :  { %v2021_v33 = vpop.f32.mrb[3].mxu0 }
 0x1a4   :  { %v2022_v49 = vadd.f32 %v2021_v33, %v2020_v52 }
 0x1a6   :  { %v635_v63 = vadd.f32 %v2022_v49, %v497_v39 }
 0x1a8   :  { %v743_v30 = vadd.f32 %v2057_v56, %v635_v63 }
 0x1b8   :  { %v2125_v46 = vpop.f32.mrb[4].mxu1 }
 0x1b9   :  { %v2126_v18 = vpop.f32.mrb[5].mxu1 }
 0x1ba   :  { %v2127_v28 = vadd.f32 %v2126_v18, %v2125_v46 }
 0x1c2   :  { %v2090_v41 = vpop.f32.mrb[4].mxu0 }
 0x1c3   :  { %v2091_v62 = vpop.f32.mrb[5].mxu0 }
 0x1c4   :  { %v2092_v40 = vadd.f32 %v2091_v62, %v2090_v41 }
 0x1c6   :  { %v911_v10 = vadd.f32 %v2092_v40, %v743_v30 }
 0x1c8   :  { %v1015_v34 = vadd.f32 %v2127_v28, %v911_v10 }
 0x1d8   :  { %v2195_v44 = vpop.f32.mrb[6].mxu1 }
 0x1d9   :  { %v2196_v48 = vpop.f32.mrb[7].mxu1 }
 0x1da   :  { %v2197_v15 = vadd.f32 %v2196_v48, %v2195_v44 }
 0x1e2   :  { %v2160_v37 = vpop.f32.mrb[6].mxu0 }
 0x1e3   :  { %v2161_v57 = vpop.f32.mrb[7].mxu0 }
 0x1e4   :  { %v2162_v51 = vadd.f32 %v2161_v57, %v2160_v37 }
 0x1e6   :  { %v1127_v11 = vadd.f32 %v2162_v51, %v1015_v34 }
 0x1e8   :  { %v1359_v21 = vadd.f32 %v2197_v15, %v1127_v11 }
 0x1f8   :  { %v2265_v47 = vpop.f32.mrb[8].mxu1 }
 0x1f9   :  { %v2266_v29 = vpop.f32.mrb[9].mxu1 }
 0x1fa   :  { %v2267_v42 = vadd.f32 %v2266_v29, %v2265_v47 }
 0x202   :  { %v2230_v26 = vpop.f32.mrb[8].mxu0 }
 0x203   :  { %v2231_v53 = vpop.f32.mrb[9].mxu0 }
 0x204   :  { %v2232_v13 = vadd.f32 %v2231_v53, %v2230_v26 }
 0x206   :  { %v1497_v9 = vadd.f32 %v2232_v13, %v1359_v21 }
 0x208   :  { %v1605_v36 = vadd.f32 %v2267_v42, %v1497_v9 }
 0x218   :  { %v2335_v45 = vpop.f32.mrb[10].mxu1 }
 0x219   :  { %v2336_v8 = vpop.f32.mrb[11].mxu1 }
 0x21a   :  { %v2337_v3 = vadd.f32 %v2336_v8, %v2335_v45 }
 0x222   :  { %v2300_v24 = vpop.f32.mrb[10].mxu0 }
 0x223   :  { %v2301_v32 = vpop.f32.mrb[11].mxu0 }
 0x224   :  { %v2302_v54 = vadd.f32 %v2301_v32, %v2300_v24 }
 0x226   :  { %v1773_v20 = vadd.f32 %v2302_v54, %v1605_v36 }
 0x228   :  { %v1877_v50 = vadd.f32 %v2337_v3, %v1773_v20 }
 0x22a   :  { %1886 = vst [vmem:[#allocation6] sm:$0xff] %v1877_v50 }
 0x22b   :  { %2770 = shalt.err (!%p2767_p12)
}
 0x22c   :  { %s2771_s28 = scalar_lea.hbm %s4241_s2, 128 }
 0x22d   :  { %p2772_p13 = scmp.ne.s32.totalorder %s4241_s2, %s2771_s28  ;;  %p2775_p0 = scmp.lt.u32.totalorder %s2771_s28, %s4241_s2 }
 0x22f   :  { %p2777_p1 = pnand %p2775_p0, %p2772_p13 }
 0x231   :  { %2780 = shalt.err (!%p2777_p1)
}
 0x232   :  { %1896 = dma.vmem_to_hbm [thread:$0]  %s1894_s1, 128, %s4241_s2, [#allocation5]  }
 0x233   :  { %2783 = dma.done.wait [#allocation5], 128  }
 0x234   :  { %2784 = vsyncadd [#allocation5], 4294967168 }
 0x235   :  { %1900 = vsyncpa [#allocation4], 1 }
 0x236   :  { %1901 = vsyncpa [#allocation5], 1 }

</bundles_post_ra>
